<compile_context>
chip_gen: v6e
topology: v6e:2x2x1
jax: 0.10.0
libtpu: 0.0.40
codegen_flags: <defaults>
</compile_context>

<pallas_src>
import functools

import jax
import jax.numpy as jnp
from jax import lax
from jax.experimental import pallas as pl
from jax.experimental.pallas import tpu as pltpu


def _linear_attention_kernel(x_ref, wqkv_ref, wout_ref, bias_ref, g_ref, o_ref,
                             *, heads, dim_head, eps):
    # x_ref:    (dim, N)          one batch element, channels-first
    # wqkv_ref: (3*hidden, dim)   hidden = heads*dim_head; v rows pre-scaled by 1/N
    # wout_ref: (dim, hidden)     pre-scaled by `scale` (= dim_head ** -0.5)
    # bias_ref: (dim, 1)          to_out conv bias
    # g_ref:    (dim, 1)          LayerNorm gain
    # o_ref:    (dim, N)
    hidden = heads * dim_head
    dim, n = x_ref.shape

    x = x_ref[...].astype(jnp.float32)

    # to_qkv 1x1 conv (bias-free) == channel mix: (3*hidden, dim) @ (dim, N).
    qkv = jnp.dot(wqkv_ref[...], x, preferred_element_type=jnp.float32)  # (3*hidden, N)

    contract_last = (((1,), (1,)), ((), ()))  # A @ B.T without materializing B.T

    acc = jnp.zeros((dim, n), dtype=jnp.float32)
    for h in range(heads):  # heads is small & static -> unrolled
        lo = h * dim_head
        qh = qkv[lo:lo + dim_head, :]                                # (dh, N)
        kh = qkv[hidden + lo:hidden + lo + dim_head, :]              # (dh, N)
        vh = qkv[2 * hidden + lo:2 * hidden + lo + dim_head, :]      # (dh, N), already /N

        # q: softmax over the head-channel axis (sublanes); normalization deferred.
        p_q = jnp.exp(qh - jnp.max(qh, axis=0, keepdims=True))       # (dh, N)
        q_den = jnp.sum(p_q, axis=0, keepdims=True)                  # (1, N)

        # k: softmax over the token axis (lanes); normalization deferred.
        p_k = jnp.exp(kh - jnp.max(kh, axis=1, keepdims=True))       # (dh, N)
        k_den = jnp.sum(p_k, axis=1, keepdims=True)                  # (dh, 1)

        # context[d, e] = sum_n softmax_k[d, n] * v[e, n]
        ctx = lax.dot_general(p_k, vh, contract_last,
                              preferred_element_type=jnp.float32)    # (dh, dh)
        ctx = ctx * pl.reciprocal(k_den, approx=False)               # apply k denom on (dh, dh)

        # Fold this head's output-projection columns into the tiny context:
        #   m[o, d] = sum_e wout[o, e] * context[d, e]
        wh = wout_ref[:, lo:lo + dim_head]                           # (dim, dh), scale folded in
        m = lax.dot_general(wh, ctx, contract_last,
                            preferred_element_type=jnp.float32)      # (dim, dh)

        # Head contribution to the projected output: (m @ exp_q) / q_den.
        head_out = jnp.dot(m, p_q, preferred_element_type=jnp.float32)  # (dim, N)
        acc = acc + head_out * pl.reciprocal(q_den, approx=False)

    y = acc + bias_ref[...]                                          # conv bias, (dim,1) bcast

    # to_out LayerNorm (channel-wise, unbiased var, eps depends on dtype).
    mean = jnp.mean(y, axis=0, keepdims=True)                        # (1, N)
    var = jnp.mean(jnp.square(y - mean), axis=0, keepdims=True)      # (1, N)
    o = (y - mean) * lax.rsqrt(var + eps) * g_ref[...]
    o_ref[...] = o.astype(o_ref.dtype)


def linear_attention_pallas(x_nchw, wqkv, wout, bias, g, *, heads, dim_head):
    """x_nchw: (b, dim, h, w). wqkv: (3*hidden, dim). wout: (dim, hidden).
    bias: (dim,) to_out conv bias. g: (dim,) LayerNorm gain."""
    b, dim, h, w = x_nchw.shape
    hidden = heads * dim_head
    n = h * w
    scale = dim_head ** (-0.5)
    eps = 1e-5 if x_nchw.dtype == jnp.float32 else 1e-3

    # Channels-first tokens: NCHW already is (dim, N) per batch -> free reshape,
    # no transposes on either side of the kernel.
    x_cf = x_nchw.reshape(b, dim, n)

    # One-time exact weight transforms:
    #  * v = v / (h*w): fold into the v rows of the bias-free qkv weight.
    #  * q * scale: post-softmax scalar on a linear path -> fold into wout.
    wqkv_mod = wqkv.at[2 * hidden:].multiply(1.0 / n)
    wout_mod = wout * scale
    bias2d = bias.reshape(dim, 1)
    g2d = g.reshape(dim, 1)

    kernel = functools.partial(_linear_attention_kernel,
                               heads=heads, dim_head=dim_head, eps=eps)

    flops = b * (2 * (3 * hidden) * dim * n
                 + heads * (2 * dim_head * dim_head * n
                            + 2 * dim * dim_head * dim_head
                            + 2 * dim * dim_head * n))
    transcendentals = b * 2 * hidden * n
    bytes_accessed = 4 * (2 * b * dim * n + 3 * hidden * dim + dim * hidden + 2 * dim)

    out_cf = pl.pallas_call(
        kernel,
        out_shape=jax.ShapeDtypeStruct((b, dim, n), x_nchw.dtype),
        grid_spec=pltpu.PrefetchScalarGridSpec(
            num_scalar_prefetch=0,
            grid=(b,),
            in_specs=[
                pl.BlockSpec((None, dim, n), lambda i: (i, 0, 0)),  # x (batch squeezed)
                pl.BlockSpec((3 * hidden, dim), lambda i: (0, 0)),  # qkv weight (v rows /N)
                pl.BlockSpec((dim, hidden), lambda i: (0, 0)),      # out weight (* scale)
                pl.BlockSpec((dim, 1), lambda i: (0, 0)),           # out bias
                pl.BlockSpec((dim, 1), lambda i: (0, 0)),           # LayerNorm g
            ],
            out_specs=pl.BlockSpec((None, dim, n), lambda i: (i, 0, 0)),
        ),
        compiler_params=pltpu.CompilerParams(
            dimension_semantics=("parallel",)),
        cost_estimate=pl.CostEstimate(flops=flops,
                                      transcendentals=transcendentals,
                                      bytes_accessed=bytes_accessed),
    )(x_cf, wqkv_mod, wout_mod, bias2d, g2d)

    return out_cf.reshape(b, dim, h, w)


def linear_attention_reference(x_nchw, wqkv, wout, bias, g, *, heads, dim_head):
    """Pure-JAX reference mirroring the PyTorch LinearAttention forward exactly."""
    b, dim, h, w = x_nchw.shape
    hidden = heads * dim_head
    scale = dim_head ** (-0.5)
    n = h * w
    eps = 1e-5 if x_nchw.dtype == jnp.float32 else 1e-3
    hp = jax.lax.Precision.HIGHEST

    x_flat = x_nchw.reshape(b, dim, n)
    qkv = jnp.einsum('oc,bcn->bon', wqkv, x_flat, precision=hp)       # (b, 3*hidden, N)
    q, k, v = jnp.split(qkv, 3, axis=1)

    def split_heads(t):  # 'b (h c) n -> b h c n'
        return t.reshape(b, heads, dim_head, n)

    q, k, v = map(split_heads, (q, k, v))
    q = jax.nn.softmax(q, axis=-2)
    k = jax.nn.softmax(k, axis=-1)
    q = q * scale
    v = v / n
    context = jnp.einsum('bhdn,bhen->bhde', k, v, precision=hp)
    out = jnp.einsum('bhde,bhdn->bhen', context, q, precision=hp)     # (b, h, dh, N)
    out = out.reshape(b, hidden, n)                                   # 'b h c (xy) -> b (h c) (xy)'
    out = jnp.einsum('oc,bcn->bon', wout, out, precision=hp) + bias[None, :, None]
    mean = jnp.mean(out, axis=1, keepdims=True)
    var = jnp.mean(jnp.square(out - mean), axis=1, keepdims=True)     # unbiased=False
    out = (out - mean) * jax.lax.rsqrt(var + eps) * g[None, :, None]
    return out.reshape(b, dim, h, w)


if __name__ == "__main__":
    # Shapes consistent with the module defaults: dim=4, heads=4, dim_head=32.
    batch, dim, H, W = 2, 4, 16, 16
    heads, dim_head = 4, 32
    hidden = heads * dim_head

    key = jax.random.PRNGKey(0)
    kx, kq, ko, kb, kg = jax.random.split(key, 5)

    x = jax.random.normal(kx, (batch, dim, H, W), dtype=jnp.float32)
    # Deterministic parameter init (1x1 conv weights squeezed to 2D).
    wqkv = jax.random.normal(kq, (3 * hidden, dim), dtype=jnp.float32) * 0.1
    wout = jax.random.normal(ko, (dim, hidden), dtype=jnp.float32) * 0.1
    bias = jax.random.normal(kb, (dim,), dtype=jnp.float32) * 0.1
    g = 1.0 + 0.1 * jax.random.normal(kg, (dim,), dtype=jnp.float32)   # LayerNorm gain

    out = linear_attention_pallas(x, wqkv, wout, bias, g, heads=heads, dim_head=dim_head)
    out = jax.block_until_ready(out)

    ref = linear_attention_reference(x, wqkv, wout, bias, g, heads=heads, dim_head=dim_head)
    assert out.shape == (batch, dim, H, W)
    assert jnp.allclose(out, ref, atol=1e-4, rtol=1e-4), "mismatch vs reference"

    print("KERNEL_OK")
</pallas_src>

<mosaic_0001>
module attributes {stable_mosaic.version = 11 : i64} {
  func.func @_linear_attention_kernel(%arg0: i32, %arg1: memref<1x4x256xf32, #tpu.memory_space<vmem>>, %arg2: memref<384x4xf32, #tpu.memory_space<vmem>>, %arg3: memref<4x128xf32, #tpu.memory_space<vmem>>, %arg4: memref<4x1xf32, #tpu.memory_space<vmem>>, %arg5: memref<4x1xf32, #tpu.memory_space<vmem>>, %arg6: memref<1x4x256xf32, #tpu.memory_space<vmem>>) attributes {dimension_semantics = [#tpu.dimension_semantics<parallel>], iteration_bounds = array<i64: 2>, scalar_prefetch = 0 : i64, scratch_operands = 0 : i64, tpu.core_type = #tpu.core_type<tc>, window_params = [{transform_indices = @transform_0, window_bounds = array<i64: 1, 4, 256>}, {pipeline_mode = #tpu.pipeline_mode<synchronous>, transform_indices = @transform_1, window_bounds = array<i64: 384, 4>}, {pipeline_mode = #tpu.pipeline_mode<synchronous>, transform_indices = @transform_2, window_bounds = array<i64: 4, 128>}, {pipeline_mode = #tpu.pipeline_mode<synchronous>, transform_indices = @transform_3, window_bounds = array<i64: 4, 1>}, {pipeline_mode = #tpu.pipeline_mode<synchronous>, transform_indices = @transform_4, window_bounds = array<i64: 4, 1>}, {transform_indices = @transform_5, window_bounds = array<i64: 1, 4, 256>}]} {
    %c0 = arith.constant 0 : index
    %c0_0 = arith.constant 0 : index
    %c0_1 = arith.constant 0 : index
    %0 = vector.load %arg1[%c0, %c0_0, %c0_1] : memref<1x4x256xf32, #tpu.memory_space<vmem>>, vector<1x4x256xf32>
    %1 = vector.shape_cast %0 : vector<1x4x256xf32> to vector<4x256xf32>
    %c0_2 = arith.constant 0 : index
    %c0_3 = arith.constant 0 : index
    %2 = vector.load %arg2[%c0_2, %c0_3] : memref<384x4xf32, #tpu.memory_space<vmem>>, vector<384x4xf32>
    %cst = arith.constant dense<0.000000e+00> : vector<384x256xf32>
    %3 = tpu.matmul %2, %1, %cst {dimension_numbers = #tpu.dot_dimension_numbers<[1], [0], [0], [1], [0, 0, 1, 1], [], []>} : vector<384x4xf32>, vector<4x256xf32>, vector<384x256xf32> -> vector<384x256xf32>
    %cst_4 = arith.constant 0.000000e+00 : f32
    %4 = vector.broadcast %cst_4 : f32 to vector<4x256xf32>
    %5 = vector.extract_strided_slice %3 {offsets = [0, 0], sizes = [32, 256], strides = [1, 1]} : vector<384x256xf32> to vector<32x256xf32>
    %6 = vector.extract_strided_slice %3 {offsets = [128, 0], sizes = [32, 256], strides = [1, 1]} : vector<384x256xf32> to vector<32x256xf32>
    %7 = vector.extract_strided_slice %3 {offsets = [256, 0], sizes = [32, 256], strides = [1, 1]} : vector<384x256xf32> to vector<32x256xf32>
    %cst_5 = arith.constant dense<0xFF800000> : vector<256xf32>
    %8 = vector.multi_reduction <maximumf>, %5, %cst_5 [0] : vector<32x256xf32> to vector<256xf32>
    %9 = vector.shape_cast %8 : vector<256xf32> to vector<1x256xf32>
    %10 = vector.broadcast %9 : vector<1x256xf32> to vector<32x256xf32>
    %11 = arith.subf %5, %10 : vector<32x256xf32>
    %12 = math.exp %11 : vector<32x256xf32>
    %cst_6 = arith.constant dense<0.000000e+00> : vector<256xf32>
    %13 = vector.multi_reduction <add>, %12, %cst_6 [0] : vector<32x256xf32> to vector<256xf32>
    %14 = vector.shape_cast %13 : vector<256xf32> to vector<1x256xf32>
    %cst_7 = arith.constant dense<0xFF800000> : vector<32xf32>
    %15 = vector.multi_reduction <maximumf>, %6, %cst_7 [1] : vector<32x256xf32> to vector<32xf32>
    %16 = vector.shape_cast %15 : vector<32xf32> to vector<32x1xf32>
    %17 = vector.broadcast %16 : vector<32x1xf32> to vector<32x256xf32>
    %18 = arith.subf %6, %17 : vector<32x256xf32>
    %19 = math.exp %18 : vector<32x256xf32>
    %cst_8 = arith.constant dense<0.000000e+00> : vector<32xf32>
    %20 = vector.multi_reduction <add>, %19, %cst_8 [1] : vector<32x256xf32> to vector<32xf32>
    %21 = vector.shape_cast %20 : vector<32xf32> to vector<32x1xf32>
    %cst_9 = arith.constant dense<0.000000e+00> : vector<32x32xf32>
    %22 = tpu.matmul %19, %7, %cst_9 {dimension_numbers = #tpu.dot_dimension_numbers<[1], [1], [0], [0], [0, 0, 1, 0], [], []>} : vector<32x256xf32>, vector<32x256xf32>, vector<32x32xf32> -> vector<32x32xf32>
    %23 = tpu.reciprocal %21 : vector<32x1xf32> -> vector<32x1xf32>
    %24 = vector.broadcast %23 : vector<32x1xf32> to vector<32x32xf32>
    %25 = arith.mulf %22, %24 : vector<32x32xf32>
    %c0_10 = arith.constant 0 : index
    %c0_11 = arith.constant 0 : index
    %26 = vector.load %arg3[%c0_10, %c0_11] : memref<4x128xf32, #tpu.memory_space<vmem>>, vector<4x32xf32>
    %cst_12 = arith.constant dense<0.000000e+00> : vector<4x32xf32>
    %27 = tpu.matmul %26, %25, %cst_12 {dimension_numbers = #tpu.dot_dimension_numbers<[1], [1], [0], [0], [0, 0, 1, 0], [], []>} : vector<4x32xf32>, vector<32x32xf32>, vector<4x32xf32> -> vector<4x32xf32>
    %cst_13 = arith.constant dense<0.000000e+00> : vector<4x256xf32>
    %28 = tpu.matmul %27, %12, %cst_13 {dimension_numbers = #tpu.dot_dimension_numbers<[1], [0], [0], [1], [0, 0, 1, 1], [], []>} : vector<4x32xf32>, vector<32x256xf32>, vector<4x256xf32> -> vector<4x256xf32>
    %29 = tpu.reciprocal %14 : vector<1x256xf32> -> vector<1x256xf32>
    %30 = vector.broadcast %29 : vector<1x256xf32> to vector<4x256xf32>
    %31 = arith.mulf %28, %30 : vector<4x256xf32>
    %32 = arith.addf %4, %31 : vector<4x256xf32>
    %33 = vector.extract_strided_slice %3 {offsets = [32, 0], sizes = [32, 256], strides = [1, 1]} : vector<384x256xf32> to vector<32x256xf32>
    %34 = vector.extract_strided_slice %3 {offsets = [160, 0], sizes = [32, 256], strides = [1, 1]} : vector<384x256xf32> to vector<32x256xf32>
    %35 = vector.extract_strided_slice %3 {offsets = [288, 0], sizes = [32, 256], strides = [1, 1]} : vector<384x256xf32> to vector<32x256xf32>
    %cst_14 = arith.constant dense<0xFF800000> : vector<256xf32>
    %36 = vector.multi_reduction <maximumf>, %33, %cst_14 [0] : vector<32x256xf32> to vector<256xf32>
    %37 = vector.shape_cast %36 : vector<256xf32> to vector<1x256xf32>
    %38 = vector.broadcast %37 : vector<1x256xf32> to vector<32x256xf32>
    %39 = arith.subf %33, %38 : vector<32x256xf32>
    %40 = math.exp %39 : vector<32x256xf32>
    %cst_15 = arith.constant dense<0.000000e+00> : vector<256xf32>
    %41 = vector.multi_reduction <add>, %40, %cst_15 [0] : vector<32x256xf32> to vector<256xf32>
    %42 = vector.shape_cast %41 : vector<256xf32> to vector<1x256xf32>
    %cst_16 = arith.constant dense<0xFF800000> : vector<32xf32>
    %43 = vector.multi_reduction <maximumf>, %34, %cst_16 [1] : vector<32x256xf32> to vector<32xf32>
    %44 = vector.shape_cast %43 : vector<32xf32> to vector<32x1xf32>
    %45 = vector.broadcast %44 : vector<32x1xf32> to vector<32x256xf32>
    %46 = arith.subf %34, %45 : vector<32x256xf32>
    %47 = math.exp %46 : vector<32x256xf32>
    %cst_17 = arith.constant dense<0.000000e+00> : vector<32xf32>
    %48 = vector.multi_reduction <add>, %47, %cst_17 [1] : vector<32x256xf32> to vector<32xf32>
    %49 = vector.shape_cast %48 : vector<32xf32> to vector<32x1xf32>
    %cst_18 = arith.constant dense<0.000000e+00> : vector<32x32xf32>
    %50 = tpu.matmul %47, %35, %cst_18 {dimension_numbers = #tpu.dot_dimension_numbers<[1], [1], [0], [0], [0, 0, 1, 0], [], []>} : vector<32x256xf32>, vector<32x256xf32>, vector<32x32xf32> -> vector<32x32xf32>
    %51 = tpu.reciprocal %49 : vector<32x1xf32> -> vector<32x1xf32>
    %52 = vector.broadcast %51 : vector<32x1xf32> to vector<32x32xf32>
    %53 = arith.mulf %50, %52 : vector<32x32xf32>
    %c0_19 = arith.constant 0 : index
    %c32 = arith.constant 32 : index
    %54 = vector.load %arg3[%c0_19, %c32] : memref<4x128xf32, #tpu.memory_space<vmem>>, vector<4x32xf32>
    %cst_20 = arith.constant dense<0.000000e+00> : vector<4x32xf32>
    %55 = tpu.matmul %54, %53, %cst_20 {dimension_numbers = #tpu.dot_dimension_numbers<[1], [1], [0], [0], [0, 0, 1, 0], [], []>} : vector<4x32xf32>, vector<32x32xf32>, vector<4x32xf32> -> vector<4x32xf32>
    %cst_21 = arith.constant dense<0.000000e+00> : vector<4x256xf32>
    %56 = tpu.matmul %55, %40, %cst_21 {dimension_numbers = #tpu.dot_dimension_numbers<[1], [0], [0], [1], [0, 0, 1, 1], [], []>} : vector<4x32xf32>, vector<32x256xf32>, vector<4x256xf32> -> vector<4x256xf32>
    %57 = tpu.reciprocal %42 : vector<1x256xf32> -> vector<1x256xf32>
    %58 = vector.broadcast %57 : vector<1x256xf32> to vector<4x256xf32>
    %59 = arith.mulf %56, %58 : vector<4x256xf32>
    %60 = arith.addf %32, %59 : vector<4x256xf32>
    %61 = vector.extract_strided_slice %3 {offsets = [64, 0], sizes = [32, 256], strides = [1, 1]} : vector<384x256xf32> to vector<32x256xf32>
    %62 = vector.extract_strided_slice %3 {offsets = [192, 0], sizes = [32, 256], strides = [1, 1]} : vector<384x256xf32> to vector<32x256xf32>
    %63 = vector.extract_strided_slice %3 {offsets = [320, 0], sizes = [32, 256], strides = [1, 1]} : vector<384x256xf32> to vector<32x256xf32>
    %cst_22 = arith.constant dense<0xFF800000> : vector<256xf32>
    %64 = vector.multi_reduction <maximumf>, %61, %cst_22 [0] : vector<32x256xf32> to vector<256xf32>
    %65 = vector.shape_cast %64 : vector<256xf32> to vector<1x256xf32>
    %66 = vector.broadcast %65 : vector<1x256xf32> to vector<32x256xf32>
    %67 = arith.subf %61, %66 : vector<32x256xf32>
    %68 = math.exp %67 : vector<32x256xf32>
    %cst_23 = arith.constant dense<0.000000e+00> : vector<256xf32>
    %69 = vector.multi_reduction <add>, %68, %cst_23 [0] : vector<32x256xf32> to vector<256xf32>
    %70 = vector.shape_cast %69 : vector<256xf32> to vector<1x256xf32>
    %cst_24 = arith.constant dense<0xFF800000> : vector<32xf32>
    %71 = vector.multi_reduction <maximumf>, %62, %cst_24 [1] : vector<32x256xf32> to vector<32xf32>
    %72 = vector.shape_cast %71 : vector<32xf32> to vector<32x1xf32>
    %73 = vector.broadcast %72 : vector<32x1xf32> to vector<32x256xf32>
    %74 = arith.subf %62, %73 : vector<32x256xf32>
    %75 = math.exp %74 : vector<32x256xf32>
    %cst_25 = arith.constant dense<0.000000e+00> : vector<32xf32>
    %76 = vector.multi_reduction <add>, %75, %cst_25 [1] : vector<32x256xf32> to vector<32xf32>
    %77 = vector.shape_cast %76 : vector<32xf32> to vector<32x1xf32>
    %cst_26 = arith.constant dense<0.000000e+00> : vector<32x32xf32>
    %78 = tpu.matmul %75, %63, %cst_26 {dimension_numbers = #tpu.dot_dimension_numbers<[1], [1], [0], [0], [0, 0, 1, 0], [], []>} : vector<32x256xf32>, vector<32x256xf32>, vector<32x32xf32> -> vector<32x32xf32>
    %79 = tpu.reciprocal %77 : vector<32x1xf32> -> vector<32x1xf32>
    %80 = vector.broadcast %79 : vector<32x1xf32> to vector<32x32xf32>
    %81 = arith.mulf %78, %80 : vector<32x32xf32>
    %c0_27 = arith.constant 0 : index
    %c64 = arith.constant 64 : index
    %82 = vector.load %arg3[%c0_27, %c64] : memref<4x128xf32, #tpu.memory_space<vmem>>, vector<4x32xf32>
    %cst_28 = arith.constant dense<0.000000e+00> : vector<4x32xf32>
    %83 = tpu.matmul %82, %81, %cst_28 {dimension_numbers = #tpu.dot_dimension_numbers<[1], [1], [0], [0], [0, 0, 1, 0], [], []>} : vector<4x32xf32>, vector<32x32xf32>, vector<4x32xf32> -> vector<4x32xf32>
    %cst_29 = arith.constant dense<0.000000e+00> : vector<4x256xf32>
    %84 = tpu.matmul %83, %68, %cst_29 {dimension_numbers = #tpu.dot_dimension_numbers<[1], [0], [0], [1], [0, 0, 1, 1], [], []>} : vector<4x32xf32>, vector<32x256xf32>, vector<4x256xf32> -> vector<4x256xf32>
    %85 = tpu.reciprocal %70 : vector<1x256xf32> -> vector<1x256xf32>
    %86 = vector.broadcast %85 : vector<1x256xf32> to vector<4x256xf32>
    %87 = arith.mulf %84, %86 : vector<4x256xf32>
    %88 = arith.addf %60, %87 : vector<4x256xf32>
    %89 = vector.extract_strided_slice %3 {offsets = [96, 0], sizes = [32, 256], strides = [1, 1]} : vector<384x256xf32> to vector<32x256xf32>
    %90 = vector.extract_strided_slice %3 {offsets = [224, 0], sizes = [32, 256], strides = [1, 1]} : vector<384x256xf32> to vector<32x256xf32>
    %91 = vector.extract_strided_slice %3 {offsets = [352, 0], sizes = [32, 256], strides = [1, 1]} : vector<384x256xf32> to vector<32x256xf32>
    %cst_30 = arith.constant dense<0xFF800000> : vector<256xf32>
    %92 = vector.multi_reduction <maximumf>, %89, %cst_30 [0] : vector<32x256xf32> to vector<256xf32>
    %93 = vector.shape_cast %92 : vector<256xf32> to vector<1x256xf32>
    %94 = vector.broadcast %93 : vector<1x256xf32> to vector<32x256xf32>
    %95 = arith.subf %89, %94 : vector<32x256xf32>
    %96 = math.exp %95 : vector<32x256xf32>
    %cst_31 = arith.constant dense<0.000000e+00> : vector<256xf32>
    %97 = vector.multi_reduction <add>, %96, %cst_31 [0] : vector<32x256xf32> to vector<256xf32>
    %98 = vector.shape_cast %97 : vector<256xf32> to vector<1x256xf32>
    %cst_32 = arith.constant dense<0xFF800000> : vector<32xf32>
    %99 = vector.multi_reduction <maximumf>, %90, %cst_32 [1] : vector<32x256xf32> to vector<32xf32>
    %100 = vector.shape_cast %99 : vector<32xf32> to vector<32x1xf32>
    %101 = vector.broadcast %100 : vector<32x1xf32> to vector<32x256xf32>
    %102 = arith.subf %90, %101 : vector<32x256xf32>
    %103 = math.exp %102 : vector<32x256xf32>
    %cst_33 = arith.constant dense<0.000000e+00> : vector<32xf32>
    %104 = vector.multi_reduction <add>, %103, %cst_33 [1] : vector<32x256xf32> to vector<32xf32>
    %105 = vector.shape_cast %104 : vector<32xf32> to vector<32x1xf32>
    %cst_34 = arith.constant dense<0.000000e+00> : vector<32x32xf32>
    %106 = tpu.matmul %103, %91, %cst_34 {dimension_numbers = #tpu.dot_dimension_numbers<[1], [1], [0], [0], [0, 0, 1, 0], [], []>} : vector<32x256xf32>, vector<32x256xf32>, vector<32x32xf32> -> vector<32x32xf32>
    %107 = tpu.reciprocal %105 : vector<32x1xf32> -> vector<32x1xf32>
    %108 = vector.broadcast %107 : vector<32x1xf32> to vector<32x32xf32>
    %109 = arith.mulf %106, %108 : vector<32x32xf32>
    %c0_35 = arith.constant 0 : index
    %c96 = arith.constant 96 : index
    %110 = vector.load %arg3[%c0_35, %c96] : memref<4x128xf32, #tpu.memory_space<vmem>>, vector<4x32xf32>
    %cst_36 = arith.constant dense<0.000000e+00> : vector<4x32xf32>
    %111 = tpu.matmul %110, %109, %cst_36 {dimension_numbers = #tpu.dot_dimension_numbers<[1], [1], [0], [0], [0, 0, 1, 0], [], []>} : vector<4x32xf32>, vector<32x32xf32>, vector<4x32xf32> -> vector<4x32xf32>
    %cst_37 = arith.constant dense<0.000000e+00> : vector<4x256xf32>
    %112 = tpu.matmul %111, %96, %cst_37 {dimension_numbers = #tpu.dot_dimension_numbers<[1], [0], [0], [1], [0, 0, 1, 1], [], []>} : vector<4x32xf32>, vector<32x256xf32>, vector<4x256xf32> -> vector<4x256xf32>
    %113 = tpu.reciprocal %98 : vector<1x256xf32> -> vector<1x256xf32>
    %114 = vector.broadcast %113 : vector<1x256xf32> to vector<4x256xf32>
    %115 = arith.mulf %112, %114 : vector<4x256xf32>
    %116 = arith.addf %88, %115 : vector<4x256xf32>
    %c0_38 = arith.constant 0 : index
    %c0_39 = arith.constant 0 : index
    %117 = vector.load %arg4[%c0_38, %c0_39] : memref<4x1xf32, #tpu.memory_space<vmem>>, vector<4x1xf32>
    %118 = vector.broadcast %117 : vector<4x1xf32> to vector<4x256xf32>
    %119 = arith.addf %116, %118 : vector<4x256xf32>
    %cst_40 = arith.constant dense<0.000000e+00> : vector<256xf32>
    %120 = vector.multi_reduction <add>, %119, %cst_40 [0] : vector<4x256xf32> to vector<256xf32>
    %121 = vector.shape_cast %120 : vector<256xf32> to vector<1x256xf32>
    %cst_41 = arith.constant 4.000000e+00 : f32
    %122 = vector.broadcast %cst_41 : f32 to vector<1x256xf32>
    %123 = arith.divf %121, %122 : vector<1x256xf32>
    %124 = vector.broadcast %123 : vector<1x256xf32> to vector<4x256xf32>
    %125 = arith.subf %119, %124 : vector<4x256xf32>
    %126 = arith.mulf %125, %125 : vector<4x256xf32>
    %cst_42 = arith.constant dense<0.000000e+00> : vector<256xf32>
    %127 = vector.multi_reduction <add>, %126, %cst_42 [0] : vector<4x256xf32> to vector<256xf32>
    %128 = vector.shape_cast %127 : vector<256xf32> to vector<1x256xf32>
    %cst_43 = arith.constant 4.000000e+00 : f32
    %129 = vector.broadcast %cst_43 : f32 to vector<1x256xf32>
    %130 = arith.divf %128, %129 : vector<1x256xf32>
    %131 = vector.broadcast %123 : vector<1x256xf32> to vector<4x256xf32>
    %132 = arith.subf %119, %131 : vector<4x256xf32>
    %cst_44 = arith.constant 9.99999974E-6 : f32
    %133 = vector.broadcast %cst_44 : f32 to vector<1x256xf32>
    %134 = arith.addf %130, %133 : vector<1x256xf32>
    %135 = math.rsqrt %134 : vector<1x256xf32>
    %136 = vector.broadcast %135 : vector<1x256xf32> to vector<4x256xf32>
    %137 = arith.mulf %132, %136 : vector<4x256xf32>
    %c0_45 = arith.constant 0 : index
    %c0_46 = arith.constant 0 : index
    %138 = vector.load %arg5[%c0_45, %c0_46] : memref<4x1xf32, #tpu.memory_space<vmem>>, vector<4x1xf32>
    %139 = vector.broadcast %138 : vector<4x1xf32> to vector<4x256xf32>
    %140 = arith.mulf %137, %139 : vector<4x256xf32>
    %c0_47 = arith.constant 0 : index
    %c0_48 = arith.constant 0 : index
    %c0_49 = arith.constant 0 : index
    %141 = vector.load %arg6[%c0_47, %c0_48, %c0_49] : memref<1x4x256xf32, #tpu.memory_space<vmem>>, vector<1x4x256xf32>
    %142 = vector.shape_cast %141 : vector<1x4x256xf32> to vector<4x256xf32>
    %143 = vector.shape_cast %140 : vector<4x256xf32> to vector<1x4x256xf32>
    tpu.vector_store %arg6[%c0_47, %c0_48, %c0_49], %143 {strides = array<i32>} : memref<1x4x256xf32, #tpu.memory_space<vmem>>, vector<1x4x256xf32>,
    return
  }
  func.func @transform_0(%arg0: i32) -> (i32, i32, i32) {
    %c0_i32 = arith.constant 0 : i32
    %c0_i32_0 = arith.constant 0 : i32
    %c0_i32_1 = arith.constant 0 : i32
    return %arg0, %c0_i32, %c0_i32_0 : i32, i32, i32
  }
  func.func @transform_1(%arg0: i32) -> (i32, i32) {
    %c0_i32 = arith.constant 0 : i32
    %c0_i32_0 = arith.constant 0 : i32
    %c0_i32_1 = arith.constant 0 : i32
    return %c0_i32, %c0_i32_0 : i32, i32
  }
  func.func @transform_2(%arg0: i32) -> (i32, i32) {
    %c0_i32 = arith.constant 0 : i32
    %c0_i32_0 = arith.constant 0 : i32
    %c0_i32_1 = arith.constant 0 : i32
    return %c0_i32, %c0_i32_0 : i32, i32
  }
  func.func @transform_3(%arg0: i32) -> (i32, i32) {
    %c0_i32 = arith.constant 0 : i32
    %c0_i32_0 = arith.constant 0 : i32
    %c0_i32_1 = arith.constant 0 : i32
    return %c0_i32, %c0_i32_0 : i32, i32
  }
  func.func @transform_4(%arg0: i32) -> (i32, i32) {
    %c0_i32 = arith.constant 0 : i32
    %c0_i32_0 = arith.constant 0 : i32
    %c0_i32_1 = arith.constant 0 : i32
    return %c0_i32, %c0_i32_0 : i32, i32
  }
  func.func @transform_5(%arg0: i32) -> (i32, i32, i32) {
    %c0_i32 = arith.constant 0 : i32
    %c0_i32_0 = arith.constant 0 : i32
    %c0_i32_1 = arith.constant 0 : i32
    return %arg0, %c0_i32, %c0_i32_0 : i32, i32, i32
  }
}

</mosaic_0001>

<bundles_post_ra>
// kernel: tpu_custom_call.1
= control target key start
LH: loop header
LB: loop body
LE: loop exit
PB: predicated region body
PF: predicated region fallthrough
CT: control target
= control target key end

     0   :  { %10 = vsyncpa [#allocation3], 0  ;;  %s3894_s0 = inlined_call_operand.vmem [shape: f32[2,4,256], index: 0, kind: input, shape index: {}]   ;;  %s3895_s1 = inlined_call_operand.vmem [shape: f32[384,4], index: 1, kind: input, shape index: {}]   ;;  %s3896_s2 = inlined_call_operand.vmem [shape: f32[4,128], index: 2, kind: input, shape index: {}]   ;;  %s3897_s3 = inlined_call_operand.vmem [shape: f32[4,1], index: 3, kind: input, shape index: {}]   ;;  %s3898_s4 = inlined_call_operand.vmem [shape: f32[4,1], index: 4, kind: input, shape index: {}]   ;;  %s3899_s5 = inlined_call_operand.hbm [shape: f32[2,4,256], index: 5, kind: output, shape index: {}]  }
   0x1   :  { %12 = vsyncpa [#allocation3 + $0x1], 0  ;;  %s2865_s18 = smov 0   ;;  %s2867_s19 = smov 0  }
   0x2   :  { %s2869_s20 = smov 0   ;;  %s2871_s21 = smov 0  }
   0x3 LB: > { %s2886_s22 = sadd.s32 4294967295, %s2826_s21   ;;  %s2384_s23 = sadd.s32 4294967294, %s2826_s21   ;;  %s2826_s21 = sphi %s2871_s21, %s4038_s21   ;;  %s2822_s20 = sphi %s2869_s20, %s4037_s20   ;;  %s2818_s19 = sphi %s2867_s19, %s4036_s19   ;;  %s2814_s18 = sphi %s2865_s18, %s4035_s18  }
   0x4   : > { %s2890_s24 = sadd.s32 1, %s2826_s21   ;;  %s135_s25 = sadd.s32 1, %s2822_s20 }
   0x5   : > { %s132_s26 = ssub.s32 %s2826_s21, %s2890_s24  ;;  %p145_p0 = scmp.ne.s32.totalorder %s2822_s20, %s2818_s19 }
   0x6   : > { %p133_p1 = scmp.eq.s32.totalorder %s132_s26, 0  ;;  %p146_p2 = scmp.eq.s32.totalorder %s2886_s22, 1 }
   0x7   : > { %p151_p3 = scmp.ne.s32.totalorder %s2818_s19, %s2814_s18  ;;  %p152_p4 = scmp.eq.s32.totalorder %s2384_s23, 1 }
   0x8   : > { %s2901_s27 = scalar_select %p133_p1, %s2822_s20, %s135_s25  }
   0x9   : > { %p2903_p5 = por %p146_p2, %p145_p0  ;;  %p2907_p6 = por %p152_p4, %p151_p3 }
   0xa   : > { %p2387_p7 = scmp.ge.s32.totalorder %s2826_s21, 1  ;;  %p190_p8 = scmp.lt.s32.totalorder %s2826_s21, 3 }
   0xc   : > { %p191_p9 = pnand %p2387_p7, %p190_p8 }
   0xe   : > { %194 = sbr.rel (%p191_p9) target bundleno = 2427 (0x97b), region = 40 }
  0x13   : > { %p218_p10 = scmp.lt.s32.totalorder %s2886_s22, 1  ;;  %v3902_v0 = vmov 0.0   ;;  %vm419_vm0 = vcmask 1043456   ;;  %v224_v3 = vld [vmem:[%s3895_s1] sm:$0xff]  ;;  %vm274_vm1 = vcmask 31744   ;;  %v225_v4 = vld [vmem:[%s3895_s1 + $0x8] sm:$0xff] }
  0x14   : > { %488 = vmatprep.mubr.f32.mxu0 %v3902_v0  ;;  %746 = vmatprep.mubr.f32.mxu1 %v3902_v0  ;;  %v226_v5 = vld [vmem:[%s3895_s1 + $0x10] sm:$0xff]  ;;  %v227_v6 = vld [vmem:[%s3895_s1 + $0x18] sm:$0xff]  ;;  %v228_v7 = vld [vmem:[%s3895_s1 + $0x20] sm:$0xff]  ;;  %vm2829_vm2 = vmmov 0   ;;  %vm979_vm3 = vcmask 261120   ;;  %s2831_s7 = smov 64  }
  0x15   : > { %s219_s30 = scalar_select %p218_p10, %s2886_s22, 1  ;;  %v229_v8 = vld [vmem:[%s3895_s1 + $0x28] sm:$0xff]  ;;  %v230_v9 = vld [vmem:[%s3895_s1 + $0x30] sm:$0xff]  ;;  %v231_v10 = vld [vmem:[%s3895_s1 + $0x38] sm:$0xff] }
  0x16   : > { %v232_v11 = vld [vmem:[%s3895_s1 + $0x40] sm:$0xff]  ;;  %v233_v12 = vld [vmem:[%s3895_s1 + $0x48] sm:$0xff]  ;;  %v234_v13 = vld [vmem:[%s3895_s1 + $0x50] sm:$0xff]  ;;  %s2832_s14 = smov 32   ;;  %s215_s25 = sand.u32 1, %s2818_s19  }
  0x17   : > { %s2470_s6 = sshll.u32 %s219_s30, 3  ;;  %v235_v14 = vld [vmem:[%s3895_s1 + $0x58] sm:$0xff]  ;;  %v236_v15 = vld [vmem:[%s3895_s1 + $0x60] sm:$0xff]  ;;  %v237_v16 = vld [vmem:[%s3895_s1 + $0x68] sm:$0xff]  ;;  %s2388_s26 = sshll.u32 %s215_s25, 3 }
  0x18   : > { %s222_s9 = scalar_lea.vmem %s3894_s0, %s2470_s6  ;;  %v238_v17 = vld [vmem:[%s3895_s1 + $0x70] sm:$0xff]  ;;  %v239_v18 = vld [vmem:[%s3895_s1 + $0x78] sm:$0xff]  ;;  %v240_v19 = vld [vmem:[%s3895_s1 + $0x80] sm:$0xff]  ;;  %s2830_s6 = smov 96  }
  0x19   : > { %v223_v1 = vld [vmem:[%s222_s9] sm:$0xff]  ;;  %v241_v20 = vld [vmem:[%s3895_s1 + $0x88] sm:$0xff]  ;;  %v242_v21 = vld [vmem:[%s3895_s1 + $0x90] sm:$0xff]  ;;  %s2471_s30 = sshll.u32 %s2886_s22, 7  ;;  %s2311_s11 = scalar_lea.sflag [#allocation3], %s215_s25 }
  0x1a   : > { %v273_v2 = vcombine.high %v223_v1, %v223_v1  ;;  %v243_v22 = vld [vmem:[%s3895_s1 + $0x98] sm:$0xff]  ;;  %v244_v23 = vld [vmem:[%s3895_s1 + $0xa0] sm:$0xff]  ;;  %v245_v24 = vld [vmem:[%s3895_s1 + $0xa8] sm:$0xff]  ;;  %s2323_s10 = scalar_lea.hbm %s3899_s5, %s2471_s30  ;;  %s2834_s13 = smov [#allocation2]  }
  0x1b   : > { %v246_v25 = vld [vmem:[%s3895_s1 + $0xb0] sm:$0xff]  ;;  %v247_v26 = vld [vmem:[%s3895_s1 + $0xb8] sm:$0xff]  ;;  %v248_v27 = vld [vmem:[%s3895_s1 + $0xc0] sm:$0xff] }
  0x1c   : > { %2391 = vmatprep.subr.msk.mxu0 %vm419_vm0, %v273_v2  ;;  %2536 = vmatprep.subr.msk.mxu1 %vm419_vm0, %v273_v2  ;;  %v249_v28 = vld [vmem:[%s3895_s1 + $0xc8] sm:$0xff]  ;;  %v250_v29 = vld [vmem:[%s3895_s1 + $0xd0] sm:$0xff]  ;;  %v251_v30 = vld [vmem:[%s3895_s1 + $0xd8] sm:$0xff] }
  0x1d   : > { %2392 = vmatpush1.msk.msra.mxu0 %vm419_vm0, %v223_v1  ;;  %2537 = vmatpush1.msk.msra.mxu1 %vm419_vm0, %v223_v1  ;;  %v252_v31 = vld [vmem:[%s3895_s1 + $0xe0] sm:$0xff]  ;;  %v253_v32 = vld [vmem:[%s3895_s1 + $0xe8] sm:$0xff]  ;;  %v254_v33 = vld [vmem:[%s3895_s1 + $0xf0] sm:$0xff] }
  0x1e   : > { %2393 = vmatmul.mubr.msk.f32.vlgmr.msra.gmra.mxu0 %vm274_vm1, %v224_v3  ;;  %v255_v34 = vld [vmem:[%s3895_s1 + $0xf8] sm:$0xff]  ;;  %v256_v35 = vld [vmem:[%s3895_s1 + $0x100] sm:$0xff]  ;;  %v257_v36 = vld [vmem:[%s3895_s1 + $0x108] sm:$0xff] }
  0x1f   : > { %494 = vmatprep.mubr.f32.mxu0 %v3902_v0  ;;  %v258_v37 = vld [vmem:[%s3895_s1 + $0x110] sm:$0xff]  ;;  %v259_v38 = vld [vmem:[%s3895_s1 + $0x118] sm:$0xff] }
  0x20   : > { %v267_v52 = vld [vmem:[%s3895_s1 + $0x158] sm:$0xff] }
  0x21   : > { %2436 = vmatmul.mubr.msk.f32.vlgmr.msra.gmra.mxu1 %vm274_vm1, %v267_v52 }
  0x22   : > { %2394 = vmatmul.mubr.msk.f32.gmra.mxu0 %vm274_vm1, %v225_v4  ;;  %752 = vmatprep.mubr.f32.mxu1 %v3902_v0 }
  0x23   : > { %500 = vmatprep.mubr.f32.mxu0 %v3902_v0 }
  0x26   : > { %2395 = vmatmul.mubr.msk.f32.gmra.mxu0 %vm274_vm1, %v226_v5 }
  0x27   : > { %506 = vmatprep.mubr.f32.mxu0 %v3902_v0 }
  0x2a   : > { %2396 = vmatmul.mubr.msk.f32.gmra.mxu0 %vm274_vm1, %v227_v6 }
  0x2b   : > { %512 = vmatprep.mubr.f32.mxu0 %v3902_v0 }
  0x2e   : > { %2397 = vmatmul.mubr.msk.f32.gmra.mxu0 %vm274_vm1, %v228_v7 }
  0x2f   : > { %518 = vmatprep.mubr.f32.mxu0 %v3902_v0 }
  0x32   : > { %2398 = vmatmul.mubr.msk.f32.gmra.mxu0 %vm274_vm1, %v229_v8 }
  0x33   : > { %524 = vmatprep.mubr.f32.mxu0 %v3902_v0 }
  0x36   : > { %2399 = vmatmul.mubr.msk.f32.gmra.mxu0 %vm274_vm1, %v230_v9 }
  0x37   : > { %530 = vmatprep.mubr.f32.mxu0 %v3902_v0 }
  0x3a   : > { %2400 = vmatmul.mubr.msk.f32.gmra.mxu0 %vm274_vm1, %v231_v10 }
  0x3b   : > { %536 = vmatprep.mubr.f32.mxu0 %v3902_v0 }
  0x3e   : > { %2401 = vmatmul.mubr.msk.f32.gmra.mxu0 %vm274_vm1, %v232_v11 }
  0x3f   : > { %542 = vmatprep.mubr.f32.mxu0 %v3902_v0 }
  0x42   : > { %2402 = vmatmul.mubr.msk.f32.gmra.mxu0 %vm274_vm1, %v233_v12 }
  0x43   : > { %548 = vmatprep.mubr.f32.mxu0 %v3902_v0 }
  0x46   : > { %2403 = vmatmul.mubr.msk.f32.gmra.mxu0 %vm274_vm1, %v234_v13 }
  0x47   : > { %554 = vmatprep.mubr.f32.mxu0 %v3902_v0 }
  0x4a   : > { %2404 = vmatmul.mubr.msk.f32.gmra.mxu0 %vm274_vm1, %v235_v14 }
  0x4b   : > { %560 = vmatprep.mubr.f32.mxu0 %v3902_v0 }
  0x4e   : > { %2405 = vmatmul.mubr.msk.f32.gmra.mxu0 %vm274_vm1, %v236_v15 }
  0x4f   : > { %566 = vmatprep.mubr.f32.mxu0 %v3902_v0 }
  0x52   : > { %2406 = vmatmul.mubr.msk.f32.gmra.mxu0 %vm274_vm1, %v237_v16 }
  0x53   : > { %572 = vmatprep.mubr.f32.mxu0 %v3902_v0 }
  0x56   : > { %2407 = vmatmul.mubr.msk.f32.gmra.mxu0 %vm274_vm1, %v238_v17 }
  0x57   : > { %578 = vmatprep.mubr.f32.mxu0 %v3902_v0 }
  0x5a   : > { %2408 = vmatmul.mubr.msk.f32.gmra.mxu0 %vm274_vm1, %v239_v18 }
  0x5b   : > { %584 = vmatprep.mubr.f32.mxu0 %v3902_v0 }
  0x5e   : > { %2409 = vmatmul.mubr.msk.f32.gmra.mxu0 %vm274_vm1, %v240_v19 }
  0x5f   : > { %590 = vmatprep.mubr.f32.mxu0 %v3902_v0 }
  0x62   : > { %2410 = vmatmul.mubr.msk.f32.gmra.mxu0 %vm274_vm1, %v241_v20 }
  0x63   : > { %596 = vmatprep.mubr.f32.mxu0 %v3902_v0 }
  0x66   : > { %2411 = vmatmul.mubr.msk.f32.gmra.mxu0 %vm274_vm1, %v242_v21 }
  0x67   : > { %602 = vmatprep.mubr.f32.mxu0 %v3902_v0 }
  0x6a   : > { %2412 = vmatmul.mubr.msk.f32.gmra.mxu0 %vm274_vm1, %v243_v22 }
  0x6b   : > { %608 = vmatprep.mubr.f32.mxu0 %v3902_v0 }
  0x6e   : > { %2413 = vmatmul.mubr.msk.f32.gmra.mxu0 %vm274_vm1, %v244_v23 }
  0x6f   : > { %614 = vmatprep.mubr.f32.mxu0 %v3902_v0 }
  0x72   : > { %2414 = vmatmul.mubr.msk.f32.gmra.mxu0 %vm274_vm1, %v245_v24 }
  0x73   : > { %620 = vmatprep.mubr.f32.mxu0 %v3902_v0 }
  0x76   : > { %2415 = vmatmul.mubr.msk.f32.gmra.mxu0 %vm274_vm1, %v246_v25 }
  0x77   : > { %626 = vmatprep.mubr.f32.mxu0 %v3902_v0 }
  0x7a   : > { %2416 = vmatmul.mubr.msk.f32.gmra.mxu0 %vm274_vm1, %v247_v26 }
  0x7b   : > { %632 = vmatprep.mubr.f32.mxu0 %v3902_v0 }
  0x7e   : > { %2417 = vmatmul.mubr.msk.f32.gmra.mxu0 %vm274_vm1, %v248_v27 }
  0x7f   : > { %638 = vmatprep.mubr.f32.mxu0 %v3902_v0 }
  0x82   : > { %2418 = vmatmul.mubr.msk.f32.gmra.mxu0 %vm274_vm1, %v249_v28 }
  0x83   : > { %644 = vmatprep.mubr.f32.mxu0 %v3902_v0 }
  0x86   : > { %2419 = vmatmul.mubr.msk.f32.gmra.mxu0 %vm274_vm1, %v250_v29 }
  0x87   : > { %650 = vmatprep.mubr.f32.mxu0 %v3902_v0 }
  0x8a   : > { %2420 = vmatmul.mubr.msk.f32.gmra.mxu0 %vm274_vm1, %v251_v30 }
  0x8b   : > { %656 = vmatprep.mubr.f32.mxu0 %v3902_v0 }
  0x8e   : > { %2421 = vmatmul.mubr.msk.f32.gmra.mxu0 %vm274_vm1, %v252_v31 }
  0x8f   : > { %662 = vmatprep.mubr.f32.mxu0 %v3902_v0 }
  0x92   : > { %2422 = vmatmul.mubr.msk.f32.gmra.mxu0 %vm274_vm1, %v253_v32 }
  0x93   : > { %668 = vmatprep.mubr.f32.mxu0 %v3902_v0 }
  0x96   : > { %2423 = vmatmul.mubr.msk.f32.gmra.mxu0 %vm274_vm1, %v254_v33 }
  0x97   : > { %674 = vmatprep.mubr.f32.mxu0 %v3902_v0 }
  0x9a   : > { %2424 = vmatmul.mubr.msk.f32.gmra.mxu0 %vm274_vm1, %v255_v34 }
  0x9b   : > { %680 = vmatprep.mubr.f32.mxu0 %v3902_v0 }
  0x9e   : > { %2425 = vmatmul.mubr.msk.f32.gmra.mxu0 %vm274_vm1, %v256_v35 }
  0x9f   : > { %686 = vmatprep.mubr.f32.mxu0 %v3902_v0 }
  0xa2   : > { %2426 = vmatmul.mubr.msk.f32.gmra.mxu0 %vm274_vm1, %v257_v36 }
  0xa3   : > { %692 = vmatprep.mubr.f32.mxu0 %v3902_v0 }
  0xa6   : > { %2427 = vmatmul.mubr.msk.f32.gmra.mxu0 %vm274_vm1, %v258_v37 }
  0xa7   : > { %698 = vmatprep.mubr.f32.mxu0 %v3902_v0 }
  0xaa   : > { %2428 = vmatmul.mubr.msk.f32.gmra.mxu0 %vm274_vm1, %v259_v38 }
  0xab   : > { %704 = vmatprep.mubr.f32.mxu0 %v3902_v0 }
  0xde   : > { %v3104_v39 = vpop.f32.mrf.mxu0 }
  0xe0   : > { %v3106_v40 = vpop.f32.mrf.mxu0 }
  0xe2   : > { %v3108_v41 = vpop.f32.mrf.mxu0 }
  0xe4   : > { %v3110_v42 = vpop.f32.mrf.mxu0 }
  0xe6   : > { %v3112_v43 = vpop.f32.mrf.mxu0 }
  0xe7   : > { %v777_v44 = vmax.f32 %v3104_v39, %v3112_v43 }
  0xe8   : > { %v3116_v45 = vpop.f32.mrf.mxu0 }
  0xe9   : > { %v786_v46 = vmax.f32 %v3106_v40, %v3116_v45 }
  0xea   : > { %v3120_v47 = vpop.f32.mrf.mxu0 }
  0xeb   : > { %v778_v48 = vmax.f32 %v3108_v41, %v3120_v47 }
  0xec   : > { %v3124_v49 = vpop.f32.mrf.mxu0 }
  0xed   : > { %v779_v50 = vmax.f32 %v777_v44, %v778_v48  ;;  %v787_v51 = vmax.f32 %v3110_v42, %v3124_v49 }
  0xee   : > { %v3131_v53 = vpop.f32.mrf.mxu0 }
  0xef   : > { %3934 = vst [vmem:[#allocation5_spill] sm:$0xff] %v3131_v53  ;;  %v780_v54 = vrot.slane %v779_v50, 4  ;;  %v788_v55 = vmax.f32 %v786_v46, %v787_v51 }
  0xf0   : > { %v3135_v56 = vpop.f32.mrf.mxu0 }
  0xf1   : > { %3935 = vst [vmem:[#allocation6_spill] sm:$0xff] %v3135_v56  ;;  %v781_v57 = vmax.f32 %v779_v50, %v780_v54  ;;  %v789_v58 = vrot.slane %v788_v55, 4 }
  0xf2   : > { %v3137_v59 = vpop.f32.mrf.mxu0 }
  0xf3   : > { %3936 = vst [vmem:[#allocation7_spill] sm:$0xff] %v3137_v59  ;;  %v782_v60 = vrot.slane %v781_v57, 2  ;;  %v790_v61 = vmax.f32 %v788_v55, %v789_v58 }
  0xf4   : > { %v3139_v62 = vpop.f32.mrf.mxu0 }
  0xf5   : > { %v783_v63 = vmax.f32 %v781_v57, %v782_v60  ;;  %v791_v1 = vrot.slane %v790_v61, 2 }
  0xf6   : > { %v3141_v2 = vpop.f32.mrf.mxu0 }
  0xf7   : > { %v784_v3 = vrot.slane %v783_v63, 1  ;;  %v792_v4 = vmax.f32 %v790_v61, %v791_v1  ;;  %v1145_v5 = vmax.f32 %v3131_v53, %v3141_v2 }
  0xf8   : > { %v3145_v6 = vpop.f32.mrf.mxu0 }
  0xf9   : > { %v3147_v7 = vmax.f32 %v783_v63, %v784_v3  ;;  %v793_v8 = vrot.slane %v792_v4, 1  ;;  %v1154_v9 = vmax.f32 %v3135_v56, %v3145_v6 }
  0xfa   : > { %v3151_v10 = vpop.f32.mrf.mxu0 }
  0xfb   : > { %v3161_v15 = vmax.f32 %v792_v4, %v793_v8  ;;  %v1146_v16 = vmax.f32 %v3137_v59, %v3151_v10 }
  0xfc   : > { %v3165_v17 = vpop.f32.mrf.mxu0 }
  0xfd   : > { %v1155_v18 = vmax.f32 %v3139_v62, %v3165_v17  ;;  %v1147_v24 = vmax.f32 %v1145_v5, %v1146_v16 }
  0xfe   : > { %v3175_v22 = vpop.f32.mrf.mxu0 }
  0xff   : > { %3937 = vst [vmem:[#allocation8_spill] sm:$0xff] %v3175_v22  ;;  %v1156_v25 = vmax.f32 %v1154_v9, %v1155_v18  ;;  %v1148_v27 = vrot.slane %v1147_v24, 4 }
 0x100   : > { %v3179_v26 = vpop.f32.mrf.mxu0 }
 0x101   : > { %3938 = vst [vmem:[#allocation9_spill] sm:$0xff] %v3179_v26  ;;  %v1157_v28 = vrot.slane %v1156_v25, 4  ;;  %v1149_v30 = vmax.f32 %v1147_v24, %v1148_v27 }
 0x102   : > { %v3181_v29 = vpop.f32.mrf.mxu0 }
 0x103   : > { %3939 = vst [vmem:[#allocation10_spill] sm:$0xff] %v3181_v29  ;;  %v1158_v31 = vmax.f32 %v1156_v25, %v1157_v28  ;;  %v1150_v33 = vrot.slane %v1149_v30, 2 }
 0x104   : > { %v3183_v32 = vpop.f32.mrf.mxu0 }
 0x105   : > { %3940 = vst [vmem:[#allocation11_spill] sm:$0xff] %v3183_v32  ;;  %v1159_v34 = vrot.slane %v1158_v31, 2  ;;  %v1151_v36 = vmax.f32 %v1149_v30, %v1150_v33 }
 0x106   : > { %v3185_v35 = vpop.f32.mrf.mxu0 }
 0x107   : > { %3941 = vst [vmem:[#allocation12_spill] sm:$0xff] %v3185_v35  ;;  %v1160_v37 = vmax.f32 %v1158_v31, %v1159_v34  ;;  %v1512_v38 = vmax.f32 %v3175_v22, %v3185_v35  ;;  %v1152_v46 = vrot.slane %v1151_v36, 1 }
 0x108   : > { %v3189_v44 = vpop.f32.mrf.mxu0 }
 0x109   : > { %3942 = vst [vmem:[#allocation13_spill] sm:$0xff] %v3189_v44  ;;  %v1161_v48 = vrot.slane %v1160_v37, 1  ;;  %v1521_v50 = vmax.f32 %v3179_v26, %v3189_v44  ;;  %v3195_v52 = vmax.f32 %v1151_v36, %v1152_v46 }
 0x10a   : > { %v3193_v51 = vpop.f32.mrf.mxu0 }
 0x10b   : > { %3943 = vst [vmem:[#allocation14_spill] sm:$0xff] %v3193_v51  ;;  %v3197_v54 = vmax.f32 %v1160_v37, %v1161_v48  ;;  %v1513_v55 = vmax.f32 %v3181_v29, %v3193_v51 }
 0x10c   : > { %v3201_v57 = vpop.f32.mrf.mxu0 }
 0x10d   : > { %3944 = vst [vmem:[#allocation15_spill] sm:$0xff] %v3201_v57  ;;  %v1514_v16 = vmax.f32 %v1512_v38, %v1513_v55  ;;  %v1522_v18 = vmax.f32 %v3183_v32, %v3201_v57 }
 0x10e   : > { %v3217_v5 = vpop.f32.mrf.mxu0 }
 0x10f   : > { %3945 = vst [vmem:[#allocation16_spill] sm:$0xff] %v3217_v5  ;;  %v1515_v25 = vrot.slane %v1514_v16, 4  ;;  %v1523_v27 = vmax.f32 %v1521_v50, %v1522_v18 }
 0x110   : > { %v3221_v9 = vpop.f32.mrf.mxu0 }
 0x111   : > { %3946 = vst [vmem:[#allocation17_spill] sm:$0xff] %v3221_v9  ;;  %v1516_v30 = vmax.f32 %v1514_v16, %v1515_v25  ;;  %v1524_v31 = vrot.slane %v1523_v27, 4 }
 0x112   : > { %v3225_v24 = vpop.f32.mrf.mxu0 }
 0x113   : > { %3947 = vst [vmem:[#allocation18_spill] sm:$0xff] %v3225_v24  ;;  %v1517_v34 = vrot.slane %v1516_v30, 2  ;;  %v1525_v37 = vmax.f32 %v1523_v27, %v1524_v31 }
 0x114   : > { %v3227_v28 = vpop.f32.mrf.mxu0 }
 0x115   : > { %3948 = vst [vmem:[#allocation19_spill] sm:$0xff] %v3227_v28  ;;  %v1518_v38 = vmax.f32 %v1516_v30, %v1517_v34  ;;  %v1526_v55 = vrot.slane %v1525_v37, 2 }
 0x116   : > { %v3229_v33 = vpop.f32.mrf.mxu0 }
 0x117   : > { %3949 = vst [vmem:[#allocation20_spill] sm:$0xff] %v3229_v33  ;;  %v1879_v36 = vmax.f32 %v3217_v5, %v3229_v33  ;;  %v1519_v50 = vrot.slane %v1518_v38, 1  ;;  %v1527_v18 = vmax.f32 %v1525_v37, %v1526_v55 }
 0x118   : > { %v3233_v46 = vpop.f32.mrf.mxu0 }
 0x119   : > { %3950 = vst [vmem:[#allocation21_spill] sm:$0xff] %v3233_v46  ;;  %v1888_v48 = vmax.f32 %v3221_v9, %v3233_v46  ;;  %v3243_v1 = vmax.f32 %v1518_v38, %v1519_v50  ;;  %v1528_v30 = vrot.slane %v1527_v18, 1 }
 0x11a   : > { %v3237_v58 = vpop.f32.mrf.mxu0 }
 0x11b   : > { %3951 = vst [vmem:[#allocation22_spill] sm:$0xff] %v3237_v58  ;;  %v1880_v16 = vmax.f32 %v3225_v24, %v3237_v58  ;;  %3953 = vst [vmem:[#allocation24_spill] sm:$0xff] %v3243_v1  ;;  %v3257_v55 = vmax.f32 %v1527_v18, %v1528_v30  ;;  %v3957_v1 = vmov 0.0  }
 0x11c   : > { %v3241_v25 = vpop.f32.mrf.mxu0 }
 0x11d   : > { %3952 = vst [vmem:[#allocation23_spill] sm:$0xff] %v3241_v25  ;;  %v1881_v60 = vmax.f32 %v1879_v36, %v1880_v16  ;;  %v1889_v27 = vmax.f32 %v3227_v28, %v3241_v25  ;;  %3954 = vst [vmem:[#allocation25_spill] sm:$0xff] %v3257_v55 }
 0x11e   : > { %v3247_v31 = vpop.f32.mrf.mxu0 }
 0x11f   : > { %v1882_v36 = vrot.slane %v1881_v60, 4  ;;  %v1890_v50 = vmax.f32 %v1888_v48, %v1889_v27 }
 0x120   : > { %v3259_v16 = vpop.f32.mrf.mxu0 }
 0x121   : > { %v837_v61 = vmax.f32 %v3247_v31, %v3259_v16  ;;  %v1883_v48 = vmax.f32 %v1881_v60, %v1882_v36  ;;  %v1891_v63 = vrot.slane %v1890_v50, 4 }
 0x122   : > { %v3267_v4 = vpop.f32.mrf.mxu0 }
 0x123   : > { %838 = vmax.xlane.f32.xlu0 %v837_v61  ;;  %v1884_v30 = vrot.slane %v1883_v48, 2  ;;  %v1892_v11 = vmax.f32 %v1890_v50, %v1891_v63  ;;  %v268_v63 = vld [vmem:[%s3895_s1 + $0x160] sm:$0xff] }
 0x124   : > { %v3273_v27 = vpop.f32.mrf.mxu0  ;;  %2437 = vmatmul.mubr.msk.f32.gmra.mxu1 %vm274_vm1, %v268_v63  ;;  %v270_v63 = vld [vmem:[%s3895_s1 + $0x170] sm:$0xff] }
 0x125   : > { %v840_v34 = vmax.f32 %v3267_v4, %v3273_v27  ;;  %v1885_v3 = vmax.f32 %v1883_v48, %v1884_v30  ;;  %v1893_v61 = vrot.slane %v1892_v11, 2  ;;  %758 = vmatprep.mubr.f32.mxu1 %v3902_v0 }
 0x126   : > { %v3275_v38 = vpop.f32.mrf.mxu0 }
 0x127   : > { %841 = vmax.xlane.f32.xlu0 %v840_v34  ;;  %v1886_v18 = vrot.slane %v1885_v3, 1  ;;  %v1894_v12 = vmax.f32 %v1892_v11, %v1893_v61  ;;  %v269_v34 = vld [vmem:[%s3895_s1 + $0x168] sm:$0xff] }
 0x128   : > { %v3279_v8 = vpop.f32.mrf.mxu0  ;;  %2438 = vmatmul.mubr.msk.f32.gmra.mxu1 %vm274_vm1, %v269_v34  ;;  %v271_v34 = vld [vmem:[%s3895_s1 + $0x178] sm:$0xff] }
 0x129   : > { %v843_v37 = vmax.f32 %v3275_v38, %v3279_v8  ;;  %v3285_v36 = vmax.f32 %v1885_v3, %v1886_v18  ;;  %v1895_v18 = vrot.slane %v1894_v12, 1  ;;  %764 = vmatprep.mubr.f32.mxu1 %v3902_v0 }
 0x12a   : > { %v3283_v60 = vpop.f32.mrf.mxu0 }
 0x12b   : > { %844 = vmax.xlane.f32.xlu1 %v843_v37  ;;  %3955 = vst [vmem:[#allocation26_spill] sm:$0xff] %v3285_v36  ;;  %v3303_v30 = vmax.f32 %v1894_v12, %v1895_v18 }
 0x12c   : > { %v3287_v19 = vpop.f32.mrf.mxu0  ;;  %2439 = vmatmul.mubr.msk.f32.gmra.mxu1 %vm274_vm1, %v270_v63 }
 0x12d   : > { %v846_v48 = vmax.f32 %v3283_v60, %v3287_v19  ;;  %3956 = vst [vmem:[#allocation27_spill] sm:$0xff] %v3303_v30  ;;  %770 = vmatprep.mubr.f32.mxu1 %v3902_v0 }
 0x12e   : > { %v3299_v3 = vpop.f32.mrf.mxu0 }
 0x12f   : > { %847 = vmax.xlane.f32.xlu1 %v846_v48 }
 0x130   : > { %v3301_v11 = vpop.f32.mrf.mxu0  ;;  %2440 = vmatmul.mubr.msk.f32.gmra.mxu1 %vm274_vm1, %v271_v34 }
 0x132   : > { %v3305_v61 = vpop.f32.mrf.mxu0 }
 0x134   : > { %v3319_v48 = vpop.f32.mrf.mxu0 }
 0x136   : > { %v3322_v18 = vpop.f32.mrf.mxu0 }
 0x138   : > { %v3324_v20 = vpop.f32.mrf.mxu0 }
 0x13a   : > { %v3330_v50 = vpop.f32.mrf.mxu0 }
 0x13c   : > { %v3336_v37 = vpop.f32.mrf.mxu0 }
 0x13e   : > { %v3339_v12 = vpop.f32.mrf.mxu0 }
 0x140   : > { %v3345_v13 = vpop.f32.mrf.mxu0 }
 0x142   : > { %v3348_v21 = vpop.f32.mrf.mxu0 }
 0x144   : > { %v3350_v14 = vpop.f32.mrf.mxu0 }
 0x146   : > { %v3352_v23 = vpop.f32.mrf.mxu0 }
 0x148   : > { %v3354_v5 = vpop.f32.mrf.mxu0 }
 0x14a   : > { %v3356_v63 = vpop.f32.mrf.mxu0 }
 0x14c   : > { %v3358_v9 = vpop.f32.mrf.mxu0 }
 0x14e   : > { %v3360_v0 = vpop.f32.mrf.mxu0 }
 0x150   : > { %v3362_v24 = vpop.f32.mrf.mxu0 }
 0x152   : > { %v3364_v28 = vpop.f32.mrf.mxu0 }
 0x154   : > { %v3366_v33 = vpop.f32.mrf.mxu0 }
 0x156   : > { %v3368_v34 = vpop.f32.mrf.mxu0 }
 0x158   : > { %v3370_v46 = vpop.f32.mrf.mxu0 }
 0x15a   : > { %v3372_v36 = vpop.f32.mrf.mxu0 }
 0x15c   : > { %v3374_v58 = vpop.f32.mrf.mxu0 }
 0x15e   : > { %v682_v30 = vpop.f32.mrf.mxu0 }
 0x160   : > { %v684_v25 = vpop.f32.mrf.mxu0 }
 0x162   : > { %v688_v22 = vpop.f32.mrf.mxu0 }
 0x164   : > { %v690_v26 = vpop.f32.mrf.mxu0 }
 0x166   : > { %v694_v29 = vpop.f32.mrf.mxu0 }
 0x168   : > { %v696_v32 = vpop.f32.mrf.mxu0 }
 0x16a   : > { %v700_v35 = vpop.f32.mrf.mxu0 }
 0x16c   : > { %v702_v44 = vpop.f32.mrf.mxu0 }
 0x16d   : > { %909 = vmatprep.subr.mxu1 %v702_v44 }
 0x16e   : > { %910 = vmatpush1.xpose.msra.mxu1 %v700_v35 }
 0x16f   : > { %911 = vmatprep.subr.mxu1 %v696_v32 }
 0x172   : > { %912 = vmatpush1.xpose.msra.mxu1 %v694_v29 }
 0x173   : > { %913 = vmatprep.subr.mxu1 %v690_v26 }
 0x176   : > { %914 = vmatpush1.xpose.msra.mxu1 %v688_v22 }
 0x177   : > { %915 = vmatprep.subr.mxu1 %v684_v25 }
 0x17a   : > { %916 = vmatpush1.xpose.msra.mxu1 %v682_v30 }
 0x17b   : > { %2492 = vmatprep.subr.mxu1 %v3957_v1 }
 0x1ac   : > { %v839_v51 = vpop.xlane.xlu0 %838 }
 0x1ad   : > { %v849_v55 = vsub.f32 %v3247_v31, %v839_v51  ;;  %v850_v57 = vsub.f32 %v3259_v16, %v839_v51 }
 0x1af   : > { %v857_v53 = vmul.f32 1.442695, %v849_v55  ;;  %v859_v56 = vmul.f32 1.442695, %v850_v57 }
 0x1b0   : > { %v842_v59 = vpop.xlane.xlu0 %841 }
 0x1b1   : > { %2586 = vpow2.f32 %v857_v53  ;;  %v851_v35 = vsub.f32 %v3267_v4, %v842_v59  ;;  %v852_v29 = vsub.f32 %v3273_v27, %v842_v59 }
 0x1b2   : > { %2588 = vpow2.f32 %v859_v56 }
 0x1b3   : > { %v861_v22 = vmul.f32 1.442695, %v851_v35  ;;  %v863_v32 = vmul.f32 1.442695, %v852_v29 }
 0x1b4   : > { %v845_v26 = vpop.xlane.xlu1 %844 }
 0x1b5   : > { %v853_v44 = vsub.f32 %v3275_v38, %v845_v26  ;;  %v854_v25 = vsub.f32 %v3279_v8, %v845_v26  ;;  %2590 = vpow2.f32 %v861_v22 }
 0x1b6   : > { %2592 = vpow2.f32 %v863_v32  ;;  %v1208_v32 = vmax.f32 %v3305_v61, %v3319_v48 }
 0x1b7   : > { %v865_v31 = vmul.f32 1.442695, %v853_v44  ;;  %v867_v30 = vmul.f32 1.442695, %v854_v25  ;;  %v1205_v44 = vmax.f32 %v3299_v3, %v3301_v11  ;;  %v1214_v25 = vmax.f32 %v3330_v50, %v3336_v37 }
 0x1b8   : > { %v848_v51 = vpop.xlane.xlu1 %847 }
 0x1b9   : > { %2594 = vpow2.f32 %v865_v31  ;;  %v855_v53 = vsub.f32 %v3283_v60, %v848_v51  ;;  %v856_v56 = vsub.f32 %v3287_v19, %v848_v51  ;;  %v1211_v31 = vmax.f32 %v3322_v18, %v3324_v20  ;;  %v261_v51 = vld [vmem:[%s3895_s1 + $0x128] sm:$0xff] }
 0x1ba   : > { %2596 = vpow2.f32 %v867_v30  ;;  %v260_v30 = vld [vmem:[%s3895_s1 + $0x120] sm:$0xff] }
 0x1bb   : > { %v869_v57 = vmul.f32 1.442695, %v855_v53  ;;  %v871_v59 = vmul.f32 1.442695, %v856_v56  ;;  %2429 = vmatmul.mubr.msk.f32.gmra.mxu0 %vm274_vm1, %v260_v30  ;;  %v262_v53 = vld [vmem:[%s3895_s1 + $0x130] sm:$0xff]  ;;  %v263_v56 = vld [vmem:[%s3895_s1 + $0x138] sm:$0xff] }
 0x1bc   : > { %710 = vmatprep.mubr.f32.mxu0 %v3957_v1 }
 0x1bd   : > { %2598 = vpow2.f32 %v869_v57 }
 0x1be   : > { %v2587_v4 = vpop.eup %2586  ;;  %2600 = vpow2.f32 %v871_v59 }
 0x1bf   : > { %v2589_v55 = vpop.eup %2588  ;;  %2430 = vmatmul.mubr.msk.f32.gmra.mxu0 %vm274_vm1, %v261_v51 }
 0x1c0   : > { %949 = vmatprep.mubr.f32.mxu1 %v2589_v55  ;;  %v873_v29 = vadd.f32 %v2589_v55, %v2587_v4  ;;  %716 = vmatprep.mubr.f32.mxu0 %v3957_v1  ;;  %v3419_v55 = vpop.f32.mrf.mxu1 }
 0x1c1   : > { %950 = vmatmul.mubr.f32.vlgmr.msra.gmra.mxu1 %v2587_v4 }
 0x1c2   : > { %v2591_v8 = vpop.eup %2590 }
 0x1c3   : > { %v2593_v38 = vpop.eup %2592  ;;  %2431 = vmatmul.mubr.msk.f32.gmra.mxu0 %vm274_vm1, %v262_v53 }
 0x1c4   : > { %954 = vmatprep.mubr.f32.mxu1 %v2593_v38  ;;  %v876_v22 = vadd.f32 %v2593_v38, %v2591_v8  ;;  %722 = vmatprep.mubr.f32.mxu0 %v3957_v1 }
 0x1c5   : > { %955 = vmatmul.mubr.f32.gmra.mxu1 %v2591_v8 }
 0x1c6   : > { %v2595_v16 = vpop.eup %2594 }
 0x1c7   : > { %v2597_v27 = vpop.eup %2596  ;;  %2432 = vmatmul.mubr.msk.f32.gmra.mxu0 %vm274_vm1, %v263_v56 }
 0x1c8   : > { %959 = vmatprep.mubr.f32.mxu1 %v2597_v27  ;;  %v879_v35 = vadd.f32 %v2597_v27, %v2595_v16  ;;  %728 = vmatprep.mubr.f32.mxu0 %v3957_v1 }
 0x1c9   : > { %960 = vmatmul.mubr.f32.gmra.mxu1 %v2595_v16 }
 0x1ca   : > { %v2599_v60 = vpop.eup %2598  ;;  %880 = vadd.xlane.f32.xlu1 %v879_v35  ;;  %v3425_v35 = vpop.f32.mrf.mxu1 }
 0x1cb   : > { %v2601_v19 = vpop.eup %2600 }
 0x1cc   : > { %964 = vmatprep.mubr.f32.mxu1 %v2601_v19  ;;  %v882_v26 = vadd.f32 %v2601_v19, %v2599_v60 }
 0x1cd   : > { %965 = vmatmul.mubr.f32.gmra.mxu1 %v2599_v60 }
 0x1ce   : > { %874 = vadd.xlane.f32.xlu1 %v873_v29  ;;  %883 = vadd.xlane.f32.xlu0 %v882_v26 }
 0x1cf   : > { %2500 = vmatprep.mubr.msk.f32.mxu1 %vm2829_vm2, %v3957_v1 }
 0x1d2   : > { %877 = vadd.xlane.f32.xlu0 %v876_v22  ;;  %1209 = vmax.xlane.f32.xlu1 %v1208_v32 }
 0x1d6   : > { %1206 = vmax.xlane.f32.xlu0 %v1205_v44  ;;  %1215 = vmax.xlane.f32.xlu1 %v1214_v25 }
 0x1da   : > { %1212 = vmax.xlane.f32.xlu0 %v1211_v31 }
 0x253   : > { %v3415_v57 = vpop.xlane.xlu1 %880 }
 0x257   : > { %v884_v59 = vpop.xlane.xlu0 %883  ;;  %v3417_v4 = vpop.xlane.xlu1 %874 }
 0x25b   : > { %v3421_v8 = vpop.xlane.xlu0 %877  ;;  %v1210_v38 = vpop.xlane.xlu1 %1209 }
 0x25c   : > { %v1219_v16 = vsub.f32 %v3305_v61, %v1210_v38  ;;  %v1220_v27 = vsub.f32 %v3319_v48, %v1210_v38  ;;  %v3431_v61 = vpop.f32.mrf.mxu1 }
 0x25d   : > { %3958 = vst [vmem:[#allocation28_spill] sm:$0xff] %v3431_v61 }
 0x25e   : > { %v1229_v29 = vmul.f32 1.442695, %v1219_v16  ;;  %v1231_v22 = vmul.f32 1.442695, %v1220_v27 }
 0x25f   : > { %v1207_v60 = vpop.xlane.xlu0 %1206  ;;  %v1216_v19 = vpop.xlane.xlu1 %1215 }
 0x260   : > { %v1223_v26 = vsub.f32 %v3330_v50, %v1216_v19  ;;  %v1224_v32 = vsub.f32 %v3336_v37, %v1216_v19  ;;  %v1217_v44 = vsub.f32 %v3299_v3, %v1207_v60  ;;  %v1218_v31 = vsub.f32 %v3301_v11, %v1207_v60  ;;  %v3435_v3 = vpop.f32.mrf.mxu1 }
 0x261   : > { %2602 = vpow2.f32 %v1229_v29  ;;  %3959 = vst [vmem:[#allocation29_spill] sm:$0xff] %v3435_v3  ;;  %v3493_v3 = vld [vmem:[%s3896_s2] sm:$0xf] }
 0x262   : > { %v1237_v25 = vmul.f32 1.442695, %v1223_v26  ;;  %v1239_v30 = vmul.f32 1.442695, %v1224_v32  ;;  %2604 = vpow2.f32 %v1231_v22  ;;  %v1225_v56 = vmul.f32 1.442695, %v1217_v44  ;;  %v3437_v11 = vpop.f32.mrf.mxu1 }
 0x263   : > { %v1213_v51 = vpop.xlane.xlu0 %1212  ;;  %v1227_v37 = vmul.f32 1.442695, %v1218_v31  ;;  %3960 = vst [vmem:[#allocation30_spill] sm:$0xff] %v3437_v11 }
 0x264   : > { %v1221_v48 = vsub.f32 %v3322_v18, %v1213_v51  ;;  %v1222_v53 = vsub.f32 %v3324_v20, %v1213_v51  ;;  %2606 = vpow2.f32 %v1237_v25  ;;  %v3439_v16 = vpop.f32.mrf.mxu1 }
 0x265   : > { %2608 = vpow2.f32 %v1239_v30  ;;  %3961 = vst [vmem:[#allocation31_spill] sm:$0xff] %v3439_v16 }
 0x266   : > { %v1233_v50 = vmul.f32 1.442695, %v1221_v48  ;;  %v1235_v38 = vmul.f32 1.442695, %v1222_v53  ;;  %v3447_v60 = vpop.f32.mrf.mxu1 }
 0x267   : > { %3962 = vst [vmem:[#allocation32_spill] sm:$0xff] %v3447_v60 }
 0x268   : > { %2610 = vpow2.f32 %v1233_v50  ;;  %v3461_v25 = vpop.f32.mrf.mxu1 }
 0x269   : > { %2612 = vpow2.f32 %v1235_v38  ;;  %3963 = vst [vmem:[#allocation33_spill] sm:$0xff] %v3461_v25 }
 0x26a   : > { %2614 = vpow2.f32 %v1225_v56  ;;  %v3467_v51 = vpop.f32.mrf.mxu1  ;;  %v1572_v56 = vmax.f32 %v3339_v12, %v3345_v13 }
 0x26b   : > { %2616 = vpow2.f32 %v1227_v37  ;;  %3964 = vst [vmem:[#allocation34_spill] sm:$0xff] %v3467_v51  ;;  %v1575_v37 = vmax.f32 %v3348_v21, %v3350_v14 }
 0x26c   : > { %v3471_v53 = vpop.f32.mrf.mxu1  ;;  %2618 = vrcp.f32 %v884_v59  ;;  %v3966_v59 = vsub.f32 %v3124_v49, %v3161_v15  ;;  %v3968_v49 = vsub.f32 %v3116_v45, %v3161_v15  ;;  %v3971_v45 = vsub.f32 %v3108_v41, %v3147_v7 }
 0x26d   : > { %3965 = vst [vmem:[#allocation35_spill] sm:$0xff] %v3471_v53  ;;  %2620 = vrcp.f32 %v3415_v57 }
 0x26e   : > { %v3441_v18 = vpop.eup %2602  ;;  %2622 = vrcp.f32 %v3421_v8 }
 0x26f   : > { %v3443_v20 = vpop.eup %2604  ;;  %2624 = vrcp.f32 %v3417_v4  ;;  %v3969_v4 = vsub.f32 %v3112_v43, %v3147_v7 }
 0x270   : > { %v1244_v30 = vadd.f32 %v3443_v20, %v3441_v18 }
 0x271   : > { %v3445_v27 = vpop.eup %2606 }
 0x272   : > { %v3449_v19 = vpop.eup %2608 }
 0x273   : > { %v1250_v26 = vadd.f32 %v3449_v19, %v3445_v27 }
 0x275   : > { %v3451_v29 = vpop.eup %2610  ;;  %1251 = vadd.xlane.f32.xlu0 %v1250_v26 }
 0x276   : > { %v3455_v22 = vpop.eup %2612 }
 0x277   : > { %v3457_v32 = vpop.eup %2614  ;;  %v1247_v44 = vadd.f32 %v3455_v22, %v3451_v29 }
 0x278   : > { %v3463_v31 = vpop.eup %2616 }
 0x279   : > { %1248 = vadd.xlane.f32.xlu1 %v1247_v44  ;;  %1245 = vadd.xlane.f32.xlu0 %v1244_v30  ;;  %v1241_v48 = vadd.f32 %v3463_v31, %v3457_v32  ;;  %v1578_v44 = vmax.f32 %v3352_v23, %v3354_v5  ;;  %v2619_v57 = vpop.eup %2618 }
 0x27d   : > { %1242 = vadd.xlane.f32.xlu1 %v1241_v48 }
 0x281   : > { %1573 = vmax.xlane.f32.xlu1 %v1572_v56  ;;  %v951_v50 = vpop.f32.mrf.mxu1  ;;  %v1581_v56 = vmax.f32 %v3356_v63, %v3358_v9 }
 0x283   : > { %v953_v38 = vpop.f32.mrf.mxu1 }
 0x284   : > { %v817_v38 = vmul.f32 1.442695, %v3966_v59  ;;  %v2621_v59 = vpop.eup %2620 }
 0x285   : > { %1576 = vmax.xlane.f32.xlu1 %v1575_v37  ;;  %v956_v26 = vpop.f32.mrf.mxu1 }
 0x286   : > { %2626 = vpow2.f32 %v817_v38  ;;  %v807_v38 = vmul.f32 1.442695, %v3971_v45 }
 0x287   : > { %v958_v30 = vpop.f32.mrf.mxu1 }
 0x289   : > { %1579 = vmax.xlane.f32.xlu1 %v1578_v44  ;;  %v961_v48 = vpop.f32.mrf.mxu1  ;;  %v3967_v44 = vsub.f32 %v3120_v47, %v3147_v7  ;;  %v811_v47 = vmul.f32 1.442695, %v3969_v4 }
 0x28b   : > { %v963_v61 = vpop.f32.mrf.mxu1  ;;  %v815_v30 = vmul.f32 1.442695, %v3967_v44  ;;  %v976_v44 = vmul.f32 %v2621_v59, %v961_v48 }
 0x28c   : > { %v813_v61 = vmul.f32 1.442695, %v3968_v49  ;;  %v3972_v49 = vsub.f32 %v3106_v40, %v3161_v15 }
 0x28d   : > { %1582 = vmax.xlane.f32.xlu1 %v1581_v56  ;;  %v966_v37 = vpop.f32.mrf.mxu1  ;;  %2628 = vpow2.f32 %v815_v30 }
 0x28e   : > { %v977_v8 = vmul.f32 %v2619_v57, %v966_v37  ;;  %v3970_v57 = vsub.f32 %v3110_v42, %v3161_v15  ;;  %v805_v43 = vmul.f32 1.442695, %v3972_v49  ;;  %2630 = vpow2.f32 %v813_v61  ;;  %v2623_v42 = vpop.eup %2622 }
 0x28f   : > { %v968_v56 = vpop.f32.mrf.mxu1  ;;  %1346 = vrot.lane.b32.xlu0 %v3493_v3, %s2830_s6  ;;  %2632 = vpow2.f32 %v811_v47  ;;  %v975_v41 = vmul.f32 %v2623_v42, %v956_v26  ;;  %v2625_v40 = vpop.eup %2624  ;;  %s217_s6 = scalar_lea.vmem [#allocation2], %s2388_s26 }
 0x290   : > { %2493 = vmatpush3.xpose.msk.msra.mxu1 %vm979_vm3, %v977_v8  ;;  %v809_v37 = vmul.f32 1.442695, %v3970_v57  ;;  %v3973_v8 = vsub.f32 %v3104_v39, %v3147_v7  ;;  %v974_v15 = vmul.f32 %v2625_v40, %v951_v50  ;;  %v3548_v47 = vpop.f32.mrf.mxu0 }
 0x291   : > { %2494 = vmatprep.subr.mxu1 %v3957_v1 }
 0x292   : > { %v803_v56 = vmul.f32 1.442695, %v3973_v8  ;;  %2634 = vpow2.f32 %v809_v37  ;;  %v3550_v59 = vpop.f32.mrf.mxu0 }
 0x293   : > { %2636 = vpow2.f32 %v807_v38  ;;  %v3520_v48 = vpop.eup %2626 }
 0x294   : > { %2495 = vmatpush3.xpose.msk.msra.mxu1 %vm979_vm3, %v976_v44  ;;  %2638 = vpow2.f32 %v805_v43  ;;  %3974 = vst [vmem:[#allocation36_spill] sm:$0xff] %v3520_v48  ;;  %v3552_v57 = vpop.f32.mrf.mxu0 }
 0x295   : > { %2496 = vmatprep.subr.mxu1 %v3957_v1  ;;  %2640 = vpow2.f32 %v803_v56 }
 0x296   : > { %v3554_v37 = vpop.f32.mrf.mxu0 }
 0x298   : > { %2497 = vmatpush3.xpose.msk.msra.mxu1 %vm979_vm3, %v975_v41  ;;  %v3556_v45 = vpop.f32.mrf.mxu0 }
 0x299   : > { %2498 = vmatprep.subr.mxu1 %v3957_v1 }
 0x29a   : > { %v3524_v39 = vpop.eup %2628  ;;  %v720_v38 = vpop.f32.mrf.mxu0 }
 0x29b   : > { %3975 = vst [vmem:[#allocation37_spill] sm:$0xff] %v3524_v39  ;;  %v3528_v7 = vpop.eup %2630 }
 0x29c   : > { %2499 = vmatpush3.xpose.msk.msra.mxu1 %vm979_vm3, %v974_v15  ;;  %3976 = vst [vmem:[#allocation38_spill] sm:$0xff] %v3528_v7  ;;  %v3532_v26 = vpop.eup %2632  ;;  %v724_v44 = vpop.f32.mrf.mxu0 }
 0x29d   : > { %1092 = vmatprep.subr.mxu1 %v3520_v48 }
 0x29e   : > { %v726_v49 = vpop.f32.mrf.mxu0 }
 0x29f   : > { %2501 = vmatmul.mubr.msk.f32.vlgmr.msra.gmra.mxu1 %vm979_vm3, %v3493_v3  ;;  %v3535_v50 = vpop.eup %2634 }
 0x2a0   : > { %1093 = vmatpush1.msra.mxu1 %v3524_v39  ;;  %1132 = vmatprep.mubr.f32.mxu1 %v3957_v1  ;;  %v3538_v30 = vpop.eup %2636 }
 0x2a1   : > { %1094 = vmatprep.subr.mxu1 %v3528_v7  ;;  %v3541_v61 = vpop.eup %2638 }
 0x2a2   : > { %1095 = vmatpush1.msra.mxu1 %v3532_v26  ;;  %v3544_v4 = vpop.eup %2640 }
 0x2a3   : > { %1096 = vmatprep.subr.mxu1 %v3535_v50 }
 0x2a4   : > { %1097 = vmatpush1.msra.mxu1 %v3538_v30 }
 0x2a5   : > { %1098 = vmatprep.subr.mxu1 %v3541_v61 }
 0x2a6   : > { %1099 = vmatpush1.msra.mxu1 %v3544_v4 }
 0x2a7   : > { %1277 = vmatprep.subr.mxu1 %v726_v49 }
 0x302   : > { %v3558_v43 = vpop.xlane.xlu1 %1248 }
 0x306   : > { %v3560_v8 = vpop.xlane.xlu1 %1242 }
 0x30a   : > { %v1574_v56 = vpop.xlane.xlu1 %1573 }
 0x30b   : > { %v1584_v48 = vsub.f32 %v3339_v12, %v1574_v56 }
 0x30e   : > { %v1577_v42 = vpop.xlane.xlu1 %1576 }
 0x30f   : > { %v1586_v41 = vsub.f32 %v3348_v21, %v1577_v42  ;;  %v1587_v40 = vsub.f32 %v3350_v14, %v1577_v42  ;;  %v1585_v14 = vsub.f32 %v3345_v13, %v1574_v56  ;;  %v1942_v13 = vmax.f32 %v3364_v28, %v3366_v33 }
 0x311   : > { %v1596_v15 = vmul.f32 1.442695, %v1586_v41  ;;  %v1598_v11 = vmul.f32 1.442695, %v1587_v40 }
 0x312   : > { %v1580_v16 = vpop.xlane.xlu1 %1579 }
 0x313   : > { %2642 = vpow2.f32 %v1596_v15  ;;  %v1588_v60 = vsub.f32 %v3352_v23, %v1580_v16  ;;  %v1589_v25 = vsub.f32 %v3354_v5, %v1580_v16  ;;  %v1594_v23 = vmul.f32 1.442695, %v1585_v14 }
 0x314   : > { %2644 = vpow2.f32 %v1598_v11  ;;  %v1592_v11 = vmul.f32 1.442695, %v1584_v48 }
 0x315   : > { %v1600_v39 = vmul.f32 1.442695, %v1588_v60  ;;  %v1602_v42 = vmul.f32 1.442695, %v1589_v25 }
 0x316   : > { %v1583_v49 = vpop.xlane.xlu1 %1582 }
 0x317   : > { %v1590_v51 = vsub.f32 %v3356_v63, %v1583_v49  ;;  %v1591_v53 = vsub.f32 %v3358_v9, %v1583_v49  ;;  %v1939_v49 = vmax.f32 %v3360_v0, %v3362_v24 }
 0x319   : > { %v1604_v21 = vmul.f32 1.442695, %v1590_v51  ;;  %v1606_v7 = vmul.f32 1.442695, %v1591_v53  ;;  %v1945_v51 = vmax.f32 %v3368_v34, %v3370_v46 }
 0x31b   : > { %2646 = vpow2.f32 %v1604_v21 }
 0x31c   : > { %2648 = vpow2.f32 %v1606_v7  ;;  %v1948_v7 = vmax.f32 %v3372_v36, %v3374_v58 }
 0x31d   : > { %2650 = vpow2.f32 %v1600_v39 }
 0x31e   : > { %2652 = vpow2.f32 %v1602_v42 }
 0x31f   : > { %2654 = vpow2.f32 %v1592_v11 }
 0x320   : > { %v3570_v5 = vpop.eup %2642  ;;  %2656 = vpow2.f32 %v1594_v23 }
 0x321   : > { %v3572_v16 = vpop.eup %2644 }
 0x322   : > { %v1611_v9 = vadd.f32 %v3572_v16, %v3570_v5 }
 0x324   : > { %1612 = vadd.xlane.f32.xlu0 %v1611_v9  ;;  %v266_v9 = vld [vmem:[%s3895_s1 + $0x150] sm:$0xff] }
 0x328   : > { %v3578_v12 = vpop.eup %2646  ;;  %1943 = vmax.xlane.f32.xlu0 %v1942_v13 }
 0x329   : > { %v3580_v63 = vpop.eup %2648 }
 0x32a   : > { %v3582_v60 = vpop.eup %2650  ;;  %v1617_v25 = vadd.f32 %v3580_v63, %v3578_v12 }
 0x32b   : > { %v3588_v53 = vpop.eup %2652 }
 0x32c   : > { %1618 = vadd.xlane.f32.xlu1 %v1617_v25  ;;  %1946 = vmax.xlane.f32.xlu0 %v1945_v51  ;;  %v3590_v48 = vpop.eup %2654  ;;  %v1614_v39 = vadd.f32 %v3588_v53, %v3582_v60 }
 0x32d   : > { %v3596_v56 = vpop.eup %2656 }
 0x32e   : > { %v1608_v41 = vadd.f32 %v3596_v56, %v3590_v48 }
 0x330   : > { %1615 = vadd.xlane.f32.xlu1 %v1614_v39  ;;  %1949 = vmax.xlane.f32.xlu0 %v1948_v7 }
 0x334   : > { %1609 = vadd.xlane.f32.xlu1 %v1608_v41 }
 0x345   : > { %1713 = vrot.lane.b32.xlu1 %v3493_v3, %s2831_s7  ;;  %s2325_s7 = sshll.u32 %s217_s6, 4  ;;  %s2326_s7 = int_to_ptr.vmem [resolvable:$true] %s2325_s7 }
 0x346   : > { %s2766_s12 = scalar_lea.vmem %s2326_s7, 128 }
 0x347   : > { %p2767_p11 = scmp.ne.s32.totalorder %s2326_s7, %s2766_s12 }
 0x349   : > { %p2768_p12 = pnand %p2767_p11, %p2903_p5 }
 0x34b   : > { %p2769_p13 = pneg %p2768_p12 }
 0x35f   : > { %v1061_v40 = vpop.f32.mrf.mxu1 }
 0x360   : > { %2446 = vmatmul.mubr.msk.f32.vlgmr.msra.gmra.mxu1 %vm979_vm3, %v1061_v40 }
 0x361   : > { %1278 = vmatpush1.xpose.msra.mxu1 %v724_v44  ;;  %v2502_v15 = vpop.f32.mrf.mxu1  ;;  %1317 = vmatprep.mubr.f32.mxu1 %v3463_v31  ;;  %v1252_v31 = vpop.xlane.xlu0 %1251 }
 0x362   : > { %1279 = vmatprep.subr.mxu1 %v720_v38 }
 0x365   : > { %1280 = vmatpush1.xpose.msra.mxu1 %v3556_v45 }
 0x366   : > { %1281 = vmatprep.subr.mxu1 %v3554_v37 }
 0x369   : > { %1940 = vmax.xlane.f32.xlu1 %v1939_v49  ;;  %1282 = vmatpush1.xpose.msra.mxu1 %v3552_v57 }
 0x36a   : > { %1283 = vmatprep.subr.mxu1 %v3550_v59 }
 0x36d   : > { %1284 = vmatpush1.xpose.msra.mxu1 %v3548_v47  ;;  %v3620_v47 = vpop.xlane.xlu0 %1245 }
 0x36e   : > { %2503 = vmatprep.subr.mxu1 %v3957_v1 }
 0x370   : > { %1318 = vmatmul.mubr.f32.vlgmr.msra.gmra.mxu1 %v3457_v32 }
 0x371   : > { %1322 = vmatprep.mubr.f32.mxu1 %v3443_v20  ;;  %v3622_v59 = vpop.permute.xlu0 %1346 }
 0x374   : > { %1323 = vmatmul.mubr.f32.gmra.mxu1 %v3441_v18 }
 0x375   : > { %1327 = vmatprep.mubr.f32.mxu1 %v3455_v22 }
 0x378   : > { %1328 = vmatmul.mubr.f32.gmra.mxu1 %v3451_v29 }
 0x379   : > { %1332 = vmatprep.mubr.f32.mxu1 %v3449_v19 }
 0x37c   : > { %1333 = vmatmul.mubr.f32.gmra.mxu1 %v3445_v27 }
 0x37d   : > { %2511 = vmatprep.mubr.msk.f32.mxu1 %vm2829_vm2, %v3957_v1 }
 0x3ad   : > { %v3624_v32 = vpop.xlane.xlu0 %1612 }
 0x3b1   : > { %v1944_v20 = vpop.xlane.xlu0 %1943 }
 0x3b2   : > { %v1953_v37 = vsub.f32 %v3364_v28, %v1944_v20  ;;  %v1954_v21 = vsub.f32 %v3366_v33, %v1944_v20  ;;  %v265_v28 = vld [vmem:[%s3895_s1 + $0x148] sm:$0xff] }
 0x3b4   : > { %v1963_v42 = vmul.f32 1.442695, %v1953_v37 }
 0x3b5   : > { %v1947_v18 = vpop.xlane.xlu0 %1946  ;;  %v3664_v7 = vpop.xlane.xlu1 %1618 }
 0x3b6   : > { %v1955_v22 = vsub.f32 %v3368_v34, %v1947_v18  ;;  %v1956_v29 = vsub.f32 %v3370_v46, %v1947_v18  ;;  %v1965_v34 = vmul.f32 1.442695, %v1954_v21 }
 0x3b8   : > { %v1967_v45 = vmul.f32 1.442695, %v1955_v22  ;;  %v1969_v14 = vmul.f32 1.442695, %v1956_v29 }
 0x3b9   : > { %v1950_v57 = vpop.xlane.xlu0 %1949  ;;  %v3666_v41 = vpop.xlane.xlu1 %1615 }
 0x3ba   : > { %v1957_v19 = vsub.f32 %v3372_v36, %v1950_v57  ;;  %v1958_v27 = vsub.f32 %v3374_v58, %v1950_v57  ;;  %v264_v58 = vld [vmem:[%s3895_s1 + $0x140] sm:$0xff] }
 0x3bb   : > { %2433 = vmatmul.mubr.msk.f32.gmra.mxu0 %vm274_vm1, %v264_v58 }
 0x3bc   : > { %v1971_v38 = vmul.f32 1.442695, %v1957_v19  ;;  %v1973_v44 = vmul.f32 1.442695, %v1958_v27  ;;  %734 = vmatprep.mubr.f32.mxu0 %v3957_v1 }
 0x3bd   : > { %v3668_v40 = vpop.xlane.xlu1 %1609 }
 0x3be   : > { %2658 = vpow2.f32 %v1971_v38 }
 0x3bf   : > { %2660 = vpow2.f32 %v1973_v44  ;;  %2434 = vmatmul.mubr.msk.f32.gmra.mxu0 %vm274_vm1, %v265_v28 }
 0x3c0   : > { %2662 = vpow2.f32 %v1967_v45  ;;  %740 = vmatprep.mubr.f32.mxu0 %v3957_v1 }
 0x3c1   : > { %2664 = vpow2.f32 %v1969_v14  ;;  %v3670_v15 = vpop.permute.xlu1 %1713  ;;  %v3977_v14 = vsub.f32 %v3165_v17, %v3197_v54  ;;  %v3980_v17 = vsub.f32 %v3141_v2, %v3195_v52 }
 0x3c2   : > { %2666 = vpow2.f32 %v1963_v42 }
 0x3c3   : > { %2668 = vpow2.f32 %v1965_v34  ;;  %2435 = vmatmul.mubr.msk.f32.gmra.mxu0 %vm274_vm1, %v266_v9  ;;  %v1185_v42 = vmul.f32 1.442695, %v3977_v14 }
 0x3cb   : > { %v3641_v33 = vpop.eup %2658 }
 0x3cc   : > { %v3644_v46 = vpop.eup %2660 }
 0x3cd   : > { %v3646_v36 = vpop.eup %2662  ;;  %v1984_v11 = vadd.f32 %v3644_v46, %v3641_v33 }
 0x3ce   : > { %v3650_v23 = vpop.eup %2664 }
 0x3cf   : > { %1985 = vadd.xlane.f32.xlu0 %v1984_v11  ;;  %v3656_v13 = vpop.eup %2666  ;;  %v1981_v25 = vadd.f32 %v3650_v23, %v3646_v36 }
 0x3d0   : > { %v3660_v51 = vpop.eup %2668 }
 0x3d1   : > { %v1978_v39 = vadd.f32 %v3660_v51, %v3656_v13 }
 0x3d3   : > { %1982 = vadd.xlane.f32.xlu0 %v1981_v25 }
 0x3d7   : > { %1979 = vadd.xlane.f32.xlu0 %v1978_v39  ;;  %v1179_v39 = vmul.f32 1.442695, %v3980_v17 }
 0x3f2   : > { %v1941_v49 = vpop.xlane.xlu1 %1940 }
 0x3f3   : > { %v1951_v20 = vsub.f32 %v3360_v0, %v1941_v49  ;;  %v1952_v18 = vsub.f32 %v3362_v24, %v1941_v49  ;;  %v3981_v49 = vsub.f32 %v3139_v62, %v3197_v54 }
 0x3f5   : > { %v1959_v22 = vmul.f32 1.442695, %v1951_v20  ;;  %v1961_v29 = vmul.f32 1.442695, %v1952_v18  ;;  %v1177_v20 = vmul.f32 1.442695, %v3981_v49 }
 0x3f7   : > { %2670 = vpow2.f32 %v1959_v22 }
 0x3f8   : > { %2672 = vpow2.f32 %v1961_v29  ;;  %v3984_v29 = vld [vmem:[#allocation6_spill] sm:$0xff] }
 0x3f9   : > { %2674 = vrcp.f32 %v1252_v31  ;;  %v3978_v31 = vsub.f32 %v3151_v10, %v3195_v52  ;;  %v3982_v10 = vld [vmem:[#allocation7_spill] sm:$0xff] }
 0x3fa   : > { %2676 = vrcp.f32 %v3558_v43  ;;  %v3979_v43 = vsub.f32 %v3145_v6, %v3197_v54  ;;  %v3983_v18 = vsub.f32 %v3982_v10, %v3195_v52  ;;  %v3990_v10 = vld [vmem:[#allocation36_spill] sm:$0xff] }
 0x3fb   : > { %2678 = vrcp.f32 %v3620_v47  ;;  %v1183_v11 = vmul.f32 1.442695, %v3978_v31 }
 0x3fc   : > { %2680 = vrcp.f32 %v3560_v8  ;;  %v1181_v25 = vmul.f32 1.442695, %v3979_v43  ;;  %v1175_v6 = vmul.f32 1.442695, %v3983_v18 }
 0x3fd   : > { %2682 = vpow2.f32 %v1185_v42 }
 0x3fe   : > { %2684 = vpow2.f32 %v1183_v11 }
 0x3ff   : > { %2686 = vpow2.f32 %v1181_v25 }
 0x400   : > { %2688 = vpow2.f32 %v1179_v39 }
 0x401   : > { %2690 = vpow2.f32 %v1177_v20 }
 0x402   : > { %2692 = vpow2.f32 %v1175_v6 }
 0x404   : > { %v3674_v57 = vpop.eup %2670 }
 0x405   : > { %v3676_v19 = vpop.eup %2672 }
 0x406   : > { %v1975_v27 = vadd.f32 %v3676_v19, %v3674_v57  ;;  %v2675_v58 = vpop.eup %2674 }
 0x407   : > { %v2677_v8 = vpop.eup %2676 }
 0x408   : > { %1976 = vadd.xlane.f32.xlu0 %v1975_v27  ;;  %v3985_v27 = vsub.f32 %v3984_v29, %v3197_v54  ;;  %v2679_v62 = vpop.eup %2678 }
 0x409   : > { %v2681_v54 = vpop.eup %2680 }
 0x40a   : > { %v1173_v2 = vmul.f32 1.442695, %v3985_v27 }
 0x40c   : > { %2694 = vpow2.f32 %v1173_v2 }
 0x41e   : > { %2080 = vrot.lane.b32.xlu0 %v3493_v3, %s2832_s14  ;;  %s2770_s14 = sshll.u32 %s2834_s13, 4  ;;  %s2771_s14 = int_to_ptr.vmem [resolvable:$false] %s2770_s14 }
 0x41f   : > { %s2772_s22 = scalar_lea.vmem %s2771_s14, 256  ;;  %p2773_p0 = scmp.lt.s32.totalorder %s2326_s7, %s2771_s14 }
 0x420   : > { %v3680_v37 = vpop.f32.mrf.mxu1  ;;  %p2774_p1 = scmp.lt.s32.totalorder %s2772_s22, %s2766_s12 }
 0x422   : > { %v3682_v45 = vpop.f32.mrf.mxu1  ;;  %p2775_p2 = por %p2774_p1, %p2773_p0 }
 0x424   : > { %p2776_p3 = pnand %p2775_p2, %p2769_p13 }
 0x430   : > { %v1319_v0 = vpop.f32.mrf.mxu1 }
 0x432   : > { %v1321_v38 = vpop.f32.mrf.mxu1 }
 0x433   : > { %v3986_v38 = vld [vmem:[#allocation5_spill] sm:$0xff] }
 0x434   : > { %v1324_v24 = vpop.f32.mrf.mxu1 }
 0x435   : > { %v1343_v42 = vmul.f32 %v2679_v62, %v1324_v24 }
 0x436   : > { %v1326_v44 = vpop.f32.mrf.mxu1 }
 0x437   : > { %v3987_v44 = vsub.f32 %v3986_v38, %v3195_v52 }
 0x438   : > { %v1329_v21 = vpop.f32.mrf.mxu1 }
 0x439   : > { %v1344_v22 = vmul.f32 %v2677_v8, %v1329_v21  ;;  %v1171_v14 = vmul.f32 1.442695, %v3987_v44  ;;  %v1342_v21 = vmul.f32 %v2681_v54, %v1319_v0 }
 0x43a   : > { %v1331_v34 = vpop.f32.mrf.mxu1 }
 0x43b   : > { %2696 = vpow2.f32 %v1171_v14  ;;  %v2683_v34 = vpop.eup %2682 }
 0x43c   : > { %v1334_v28 = vpop.f32.mrf.mxu1  ;;  %v2685_v52 = vpop.eup %2684 }
 0x43d   : > { %v1345_v9 = vmul.f32 %v2675_v58, %v1334_v28  ;;  %v2687_v58 = vpop.eup %2686 }
 0x43e   : > { %v1336_v47 = vpop.f32.mrf.mxu1  ;;  %v2689_v24 = vpop.eup %2688 }
 0x43f   : > { %2504 = vmatpush3.xpose.msk.msra.mxu1 %vm979_vm3, %v1345_v9  ;;  %v2691_v28 = vpop.eup %2690 }
 0x440   : > { %2505 = vmatprep.subr.mxu1 %v3957_v1  ;;  %v2693_v31 = vpop.eup %2692 }
 0x441   : > { %v2695_v11 = vpop.eup %2694 }
 0x443   : > { %2506 = vmatpush3.xpose.msk.msra.mxu1 %vm979_vm3, %v1344_v22 }
 0x444   : > { %2507 = vmatprep.subr.mxu1 %v3957_v1 }
 0x447   : > { %2508 = vmatpush3.xpose.msk.msra.mxu1 %vm979_vm3, %v1343_v42 }
 0x448   : > { %2509 = vmatprep.subr.mxu1 %v3957_v1  ;;  %v2697_v0 = vpop.eup %2696 }
 0x44b   : > { %2510 = vmatpush3.xpose.msk.msra.mxu1 %vm979_vm3, %v1342_v21 }
 0x44c   : > { %1459 = vmatprep.subr.mxu1 %v2683_v34 }
 0x44e   : > { %2512 = vmatmul.mubr.msk.f32.vlgmr.msra.gmra.mxu1 %vm979_vm3, %v3622_v59 }
 0x44f   : > { %1460 = vmatpush1.msra.mxu1 %v2685_v52  ;;  %1499 = vmatprep.mubr.f32.mxu1 %v3957_v1 }
 0x450   : > { %1461 = vmatprep.subr.mxu1 %v2687_v58 }
 0x451   : > { %1462 = vmatpush1.msra.mxu1 %v2689_v24 }
 0x452   : > { %1463 = vmatprep.subr.mxu1 %v2691_v28 }
 0x453   : > { %1464 = vmatpush1.msra.mxu1 %v2693_v31 }
 0x454   : > { %1465 = vmatprep.subr.mxu1 %v2695_v11 }
 0x455   : > { %1466 = vmatpush1.msra.mxu1 %v2697_v0 }
 0x456   : > { %1644 = vmatprep.subr.mxu1 %v3425_v35  ;;  %v1187_v35 = vadd.f32 %v2697_v0, %v2693_v31 }
 0x47b   : > { %v730_v9 = vpop.f32.mrf.mxu0 }
 0x47d   : > { %v732_v43 = vpop.f32.mrf.mxu0 }
 0x47f   : > { %v736_v59 = vpop.f32.mrf.mxu0 }
 0x481   : > { %v738_v25 = vpop.f32.mrf.mxu0 }
 0x483   : > { %v742_v47 = vpop.f32.mrf.mxu0 }
 0x485   : > { %v744_v39 = vpop.f32.mrf.mxu0 }
 0x50e   : > { %v1428_v17 = vpop.f32.mrf.mxu1 }
 0x50f   : > { %2452 = vmatmul.mubr.msk.f32.vlgmr.msra.gmra.mxu1 %vm979_vm3, %v1428_v17 }
 0x510   : > { %1645 = vmatpush1.xpose.msra.mxu1 %v3419_v55  ;;  %v2513_v8 = vpop.f32.mrf.mxu1  ;;  %1684 = vmatprep.mubr.f32.mxu1 %v3596_v56  ;;  %v819_v55 = vadd.f32 %v3544_v4, %v3538_v30  ;;  %v3988_v56 = vld [vmem:[#allocation38_spill] sm:$0xff] }
 0x511   : > { %1646 = vmatprep.subr.mxu1 %v744_v39 }
 0x514   : > { %1647 = vmatpush1.xpose.msra.mxu1 %v742_v47 }
 0x515   : > { %1648 = vmatprep.subr.mxu1 %v738_v25 }
 0x518   : > { %1649 = vmatpush1.xpose.msra.mxu1 %v736_v59 }
 0x519   : > { %1650 = vmatprep.subr.mxu1 %v732_v43 }
 0x51c   : > { %1651 = vmatpush1.xpose.msra.mxu1 %v730_v9 }
 0x51d   : > { %2514 = vmatprep.subr.mxu1 %v3957_v1 }
 0x51f   : > { %1685 = vmatmul.mubr.f32.vlgmr.msra.gmra.mxu1 %v3590_v48  ;;  %v1196_v48 = vadd.f32 %v2695_v11, %v2691_v28 }
 0x520   : > { %1689 = vmatprep.mubr.f32.mxu1 %v3572_v16  ;;  %v828_v16 = vadd.f32 %v3541_v61, %v3535_v50 }
 0x521   : > { %v1197_v49 = vadd.f32 %v2687_v58, %v1196_v48 }
 0x523   : > { %1690 = vmatmul.mubr.f32.gmra.mxu1 %v3570_v5  ;;  %v820_v5 = vadd.f32 %v3532_v26, %v819_v55  ;;  %v1198_v6 = vadd.f32 %v2683_v34, %v1197_v49  ;;  %v3991_v49 = vld [vmem:[#allocation15_spill] sm:$0xff] }
 0x524   : > { %1694 = vmatprep.mubr.f32.mxu1 %v3588_v53  ;;  %v1188_v53 = vadd.f32 %v2689_v24, %v1187_v35 }
 0x525   : > { %v1199_v4 = vrot.slane %v1198_v6, 4 }
 0x527   : > { %1695 = vmatmul.mubr.f32.gmra.mxu1 %v3582_v60  ;;  %v829_v60 = vadd.f32 %v3988_v56, %v828_v16  ;;  %v1200_v61 = vadd.f32 %v1199_v4, %v1198_v6  ;;  %v3994_v6 = vld [vmem:[#allocation14_spill] sm:$0xff] }
 0x528   : > { %1699 = vmatprep.mubr.f32.mxu1 %v3580_v63  ;;  %v3989_v63 = vld [vmem:[#allocation37_spill] sm:$0xff] }
 0x529   : > { %v821_v20 = vadd.f32 %v3989_v63, %v820_v5  ;;  %v830_v18 = vadd.f32 %v3990_v10, %v829_v60  ;;  %v1201_v14 = vrot.slane %v1200_v61, 2  ;;  %v3992_v63 = vld [vmem:[#allocation25_spill] sm:$0xff] }
 0x52b   : > { %1700 = vmatmul.mubr.f32.gmra.mxu1 %v3578_v12  ;;  %v1189_v12 = vadd.f32 %v2685_v52, %v1188_v53  ;;  %v822_v22 = vrot.slane %v821_v20, 4  ;;  %v831_v30 = vrot.slane %v830_v18, 4  ;;  %v1202_v21 = vadd.f32 %v1201_v14, %v1200_v61  ;;  %v4003_v14 = vld [vmem:[#allocation10_spill] sm:$0xff] }
 0x52c   : > { %2522 = vmatprep.mubr.msk.f32.mxu1 %vm2829_vm2, %v3957_v1 }
 0x52d   : > { %v1190_v29 = vrot.slane %v1189_v12, 4  ;;  %v823_v27 = vadd.f32 %v822_v22, %v821_v20  ;;  %v832_v50 = vadd.f32 %v831_v30, %v830_v18  ;;  %v1203_v34 = vrot.slane %v1202_v21, 1 }
 0x52e   : > { %v3993_v20 = vsub.f32 %v3991_v49, %v3992_v63  ;;  %v4014_v49 = vld [vmem:[#allocation30_spill] sm:$0xff] }
 0x52f   : > { %v1191_v2 = vadd.f32 %v1190_v29, %v1189_v12  ;;  %v824_v38 = vrot.slane %v823_v27, 2  ;;  %v833_v44 = vrot.slane %v832_v50, 2  ;;  %v1204_v0 = vadd.f32 %v1203_v34, %v1202_v21  ;;  %v4005_v21 = vld [vmem:[#allocation9_spill] sm:$0xff] }
 0x531   : > { %v1192_v26 = vrot.slane %v1191_v2, 2  ;;  %v825_v62 = vadd.f32 %v824_v38, %v823_v27  ;;  %v834_v54 = vadd.f32 %v833_v44, %v832_v50  ;;  %v4001_v38 = vld [vmem:[#allocation11_spill] sm:$0xff] }
 0x533   : > { %v1193_v42 = vadd.f32 %v1192_v26, %v1191_v2  ;;  %v826_v52 = vrot.slane %v825_v62, 1  ;;  %v835_v24 = vrot.slane %v834_v54, 1  ;;  %v3999_v2 = vld [vmem:[#allocation12_spill] sm:$0xff]  ;;  %v4002_v26 = vsub.f32 %v4001_v38, %v3992_v63  ;;  %v1986_v38 = vpop.xlane.xlu0 %1985 }
 0x535   : > { %v1194_v58 = vrot.slane %v1193_v42, 1  ;;  %v827_v28 = vadd.f32 %v826_v52, %v825_v62  ;;  %v836_v11 = vadd.f32 %v835_v24, %v834_v54  ;;  %v1544_v44 = vmul.f32 1.442695, %v4002_v26  ;;  %v4007_v24 = vld [vmem:[#allocation8_spill] sm:$0xff] }
 0x536   : > { %v4006_v52 = vsub.f32 %v4005_v21, %v3992_v63 }
 0x537   : > { %v1195_v31 = vadd.f32 %v1194_v58, %v1193_v42  ;;  %2698 = vrcp.f32 %v827_v28  ;;  %v1983_v26 = vpop.xlane.xlu0 %1982 }
 0x538   : > { %v1540_v58 = vmul.f32 1.442695, %v4006_v52 }
 0x539   : > { %2700 = vrcp.f32 %v1195_v31 }
 0x53a   : > { %2702 = vrcp.f32 %v836_v11 }
 0x53b   : > { %2704 = vrcp.f32 %v1204_v0 }
 0x53c   : > { %2706 = vrcp.f32 %v3664_v7  ;;  %v3995_v7 = vld [vmem:[#allocation24_spill] sm:$0xff] }
 0x53d   : > { %2708 = vrcp.f32 %v3666_v41  ;;  %v3996_v22 = vsub.f32 %v3994_v6, %v3995_v7  ;;  %v3997_v41 = vld [vmem:[#allocation13_spill] sm:$0xff]  ;;  %v4000_v50 = vsub.f32 %v3999_v2, %v3995_v7  ;;  %v4004_v62 = vsub.f32 %v4003_v14, %v3995_v7 }
 0x53e   : > { %2710 = vrcp.f32 %v3624_v32  ;;  %v3998_v4 = vsub.f32 %v3997_v41, %v3992_v63  ;;  %v4008_v34 = vsub.f32 %v4007_v24, %v3995_v7  ;;  %v4015_v63 = vld [vmem:[#allocation29_spill] sm:$0xff]  ;;  %v4018_v24 = vld [vmem:[#allocation27_spill] sm:$0xff] }
 0x53f   : > { %2712 = vrcp.f32 %v3668_v40  ;;  %v1550_v29 = vmul.f32 1.442695, %v3996_v22  ;;  %v1546_v61 = vmul.f32 1.442695, %v4000_v50  ;;  %v1542_v42 = vmul.f32 1.442695, %v4004_v62  ;;  %v1980_v62 = vpop.xlane.xlu0 %1979 }
 0x540   : > { %v1548_v27 = vmul.f32 1.442695, %v3998_v4  ;;  %v1538_v28 = vmul.f32 1.442695, %v4008_v34 }
 0x543   : > { %v1977_v21 = vpop.xlane.xlu0 %1976 }
 0x544   : > { %v2699_v9 = vpop.eup %2698 }
 0x545   : > { %v1141_v47 = vmul.f32 %v2699_v9, %v3680_v37 }
 0x546   : > { %v2701_v43 = vpop.eup %2700 }
 0x547   : > { %v2703_v25 = vpop.eup %2702 }
 0x548   : > { %v2705_v39 = vpop.eup %2704  ;;  %v1142_v55 = vmul.f32 %v2703_v25, %v3682_v45  ;;  %v1552_v45 = vmul.f32 1.442695, %v3993_v20  ;;  %v4016_v20 = vld [vmem:[#allocation28_spill] sm:$0xff] }
 0x549   : > { %v2707_v10 = vpop.eup %2706 }
 0x54a   : > { %2714 = vpow2.f32 %v1552_v45  ;;  %v2709_v40 = vpop.eup %2708 }
 0x54b   : > { %2716 = vpow2.f32 %v1550_v29  ;;  %v2711_v31 = vpop.eup %2710 }
 0x54c   : > { %2718 = vpow2.f32 %v1548_v27  ;;  %v2713_v0 = vpop.eup %2712 }
 0x54d   : > { %2720 = vpow2.f32 %v1546_v61 }
 0x54e   : > { %2722 = vpow2.f32 %v1544_v44 }
 0x54f   : > { %2724 = vpow2.f32 %v1542_v42 }
 0x550   : > { %2726 = vpow2.f32 %v1540_v58  ;;  %v4017_v58 = vld [vmem:[#allocation23_spill] sm:$0xff] }
 0x551   : > { %2728 = vpow2.f32 %v1538_v28 }
 0x5cf   : > { %v1501_v59 = vpop.f32.mrf.mxu1 }
 0x5d0   : > { %v1508_v17 = vmul.f32 %v2701_v43, %v1501_v59  ;;  %v2715_v43 = vpop.eup %2714 }
 0x5d1   : > { %v1503_v8 = vpop.f32.mrf.mxu1  ;;  %v2717_v59 = vpop.eup %2716 }
 0x5d2   : > { %v3745_v35 = vadd.f32 %v1508_v17, %v1141_v47  ;;  %v1509_v16 = vmul.f32 %v2705_v39, %v1503_v8  ;;  %v2719_v25 = vpop.eup %2718 }
 0x5d3   : > { %v2721_v47 = vpop.eup %2720 }
 0x5d4   : > { %v3747_v48 = vadd.f32 %v1509_v16, %v1142_v55  ;;  %v2723_v17 = vpop.eup %2722  ;;  %v4009_v16 = vld [vmem:[#allocation35_spill] sm:$0xff] }
 0x5d5   : > { %v2725_v39 = vpop.eup %2724 }
 0x5d6   : > { %v2727_v8 = vpop.eup %2726 }
 0x5d7   : > { %v2729_v55 = vpop.eup %2728 }
 0x5d8   : > { %v1554_v3 = vadd.f32 %v2729_v55, %v2725_v39 }
 0x5da   : > { %v1555_v45 = vadd.f32 %v2721_v47, %v1554_v3 }
 0x5df   : > { %v1686_v5 = vpop.f32.mrf.mxu1 }
 0x5e0   : > { %v1709_v9 = vmul.f32 %v2713_v0, %v1686_v5  ;;  %v4010_v5 = vld [vmem:[#allocation34_spill] sm:$0xff] }
 0x5e1   : > { %v1688_v53 = vpop.f32.mrf.mxu1  ;;  %v4021_v0 = vld [vmem:[#allocation26_spill] sm:$0xff] }
 0x5e3   : > { %v1691_v56 = vpop.f32.mrf.mxu1 }
 0x5e4   : > { %v1710_v11 = vmul.f32 %v2711_v31, %v1691_v56  ;;  %v4011_v56 = vld [vmem:[#allocation33_spill] sm:$0xff] }
 0x5e5   : > { %v1693_v60 = vpop.f32.mrf.mxu1 }
 0x5e6   : > { %v4012_v60 = vld [vmem:[#allocation32_spill] sm:$0xff] }
 0x5e7   : > { %v1696_v37 = vpop.f32.mrf.mxu1 }
 0x5e8   : > { %v1711_v54 = vmul.f32 %v2709_v40, %v1696_v37  ;;  %v4013_v37 = vld [vmem:[#allocation31_spill] sm:$0xff] }
 0x5e9   : > { %v1698_v12 = vpop.f32.mrf.mxu1 }
 0x5eb   : > { %v1701_v18 = vpop.f32.mrf.mxu1 }
 0x5ec   : > { %v1712_v30 = vmul.f32 %v2707_v10, %v1701_v18 }
 0x5ed   : > { %v1703_v32 = vpop.f32.mrf.mxu1 }
 0x5ee   : > { %2515 = vmatpush3.xpose.msk.msra.mxu1 %vm979_vm3, %v1712_v30 }
 0x5ef   : > { %2516 = vmatprep.subr.mxu1 %v3957_v1 }
 0x5f2   : > { %2517 = vmatpush3.xpose.msk.msra.mxu1 %vm979_vm3, %v1711_v54 }
 0x5f3   : > { %2518 = vmatprep.subr.mxu1 %v3957_v1 }
 0x5f6   : > { %2519 = vmatpush3.xpose.msk.msra.mxu1 %vm979_vm3, %v1710_v11  ;;  %v4020_v11 = vld [vmem:[#allocation22_spill] sm:$0xff] }
 0x5f7   : > { %2520 = vmatprep.subr.mxu1 %v3957_v1 }
 0x5fa   : > { %2521 = vmatpush3.xpose.msk.msra.mxu1 %vm979_vm3, %v1709_v9  ;;  %v4022_v9 = vsub.f32 %v4020_v11, %v4021_v0 }
 0x5fb   : > { %1826 = vmatprep.subr.mxu1 %v2715_v43 }
 0x5fd   : > { %2523 = vmatmul.mubr.msk.f32.vlgmr.msra.gmra.mxu1 %vm979_vm3, %v3670_v15 }
 0x5fe   : > { %1827 = vmatpush1.msra.mxu1 %v2717_v59  ;;  %1866 = vmatprep.mubr.f32.mxu1 %v3957_v1 }
 0x5ff   : > { %1828 = vmatprep.subr.mxu1 %v2719_v25 }
 0x600   : > { %1829 = vmatpush1.msra.mxu1 %v2721_v47 }
 0x601   : > { %1830 = vmatprep.subr.mxu1 %v2723_v17 }
 0x602   : > { %1831 = vmatpush1.msra.mxu1 %v2725_v39 }
 0x603   : > { %1832 = vmatprep.subr.mxu1 %v2727_v8 }
 0x604   : > { %1833 = vmatpush1.msra.mxu1 %v2729_v55 }
 0x605   : > { %2011 = vmatprep.subr.mxu1 %v4009_v16 }
 0x6bd   : > { %v1795_v15 = vpop.f32.mrf.mxu1 }
 0x6be   : > { %2458 = vmatmul.mubr.msk.f32.vlgmr.msra.gmra.mxu1 %vm979_vm3, %v1795_v15 }
 0x6bf   : > { %2012 = vmatpush1.xpose.msra.mxu1 %v4010_v5  ;;  %v2524_v53 = vpop.f32.mrf.mxu1  ;;  %2051 = vmatprep.mubr.f32.mxu1 %v3676_v19  ;;  %v1563_v19 = vadd.f32 %v2727_v8, %v2723_v17  ;;  %v4025_v8 = vld [vmem:[#allocation20_spill] sm:$0xff]  ;;  %v4027_v5 = vld [vmem:[#allocation19_spill] sm:$0xff] }
 0x6c0   : > { %2013 = vmatprep.subr.mxu1 %v4011_v56  ;;  %v4026_v55 = vsub.f32 %v4025_v8, %v4021_v0  ;;  %v4028_v53 = vsub.f32 %v4027_v5, %v4018_v24 }
 0x6c1   : > { %v1564_v12 = vadd.f32 %v2719_v25, %v1563_v19  ;;  %v4023_v25 = vld [vmem:[#allocation21_spill] sm:$0xff] }
 0x6c2   : > { %v4024_v47 = vsub.f32 %v4023_v25, %v4018_v24  ;;  %v1913_v16 = vmul.f32 1.442695, %v4026_v55  ;;  %v1911_v56 = vmul.f32 1.442695, %v4028_v53 }
 0x6c3   : > { %2014 = vmatpush1.xpose.msra.mxu1 %v4012_v60  ;;  %v1565_v10 = vadd.f32 %v2715_v43, %v1564_v12  ;;  %v1917_v43 = vmul.f32 1.442695, %v4022_v9  ;;  %v4029_v60 = vld [vmem:[#allocation18_spill] sm:$0xff] }
 0x6c4   : > { %2015 = vmatprep.subr.mxu1 %v4013_v37  ;;  %v1915_v17 = vmul.f32 1.442695, %v4024_v47  ;;  %v4030_v37 = vsub.f32 %v4029_v60, %v4021_v0 }
 0x6c5   : > { %v1566_v18 = vrot.slane %v1565_v10, 4 }
 0x6c7   : > { %2016 = vmatpush1.xpose.msra.mxu1 %v4014_v49  ;;  %v1567_v6 = vadd.f32 %v1566_v18, %v1565_v10  ;;  %v1909_v49 = vmul.f32 1.442695, %v4030_v37 }
 0x6c8   : > { %2017 = vmatprep.subr.mxu1 %v4015_v63 }
 0x6c9   : > { %v1568_v7 = vrot.slane %v1567_v6, 2 }
 0x6cb   : > { %2018 = vmatpush1.xpose.msra.mxu1 %v4016_v20  ;;  %v1569_v22 = vadd.f32 %v1568_v7, %v1567_v6  ;;  %v4031_v20 = vld [vmem:[#allocation17_spill] sm:$0xff] }
 0x6cc   : > { %2525 = vmatprep.subr.mxu1 %v3957_v1  ;;  %v4032_v3 = vsub.f32 %v4031_v20, %v4018_v24 }
 0x6cd   : > { %v1570_v29 = vrot.slane %v1569_v22, 1 }
 0x6ce   : > { %2052 = vmatmul.mubr.f32.vlgmr.msra.gmra.mxu1 %v3674_v57  ;;  %v1556_v57 = vadd.f32 %v2717_v59, %v1555_v45  ;;  %v1907_v19 = vmul.f32 1.442695, %v4032_v3  ;;  %v4033_v45 = vld [vmem:[#allocation16_spill] sm:$0xff] }
 0x6cf   : > { %2056 = vmatprep.mubr.f32.mxu1 %v3660_v51  ;;  %v1571_v30 = vadd.f32 %v1570_v29, %v1569_v22  ;;  %v4034_v12 = vsub.f32 %v4033_v45, %v4021_v0 }
 0x6d0   : > { %v1557_v51 = vrot.slane %v1556_v57, 4 }
 0x6d2   : > { %2057 = vmatmul.mubr.f32.gmra.mxu1 %v3656_v13  ;;  %v1558_v13 = vadd.f32 %v1557_v51, %v1556_v57  ;;  %v1905_v57 = vmul.f32 1.442695, %v4034_v12 }
 0x6d3   : > { %2061 = vmatprep.mubr.f32.mxu1 %v3650_v23 }
 0x6d4   : > { %v1559_v23 = vrot.slane %v1558_v13, 2 }
 0x6d6   : > { %2062 = vmatmul.mubr.f32.gmra.mxu1 %v3646_v36  ;;  %v1560_v36 = vadd.f32 %v1559_v23, %v1558_v13  ;;  %v2081_v23 = vpop.permute.xlu0 %2080 }
 0x6d7   : > { %2066 = vmatprep.mubr.f32.mxu1 %v3644_v46 }
 0x6d8   : > { %v1561_v46 = vrot.slane %v1560_v36, 1 }
 0x6da   : > { %2067 = vmatmul.mubr.f32.gmra.mxu1 %v3641_v33  ;;  %v1562_v33 = vadd.f32 %v1561_v46, %v1560_v36 }
 0x6db   : > { %2533 = vmatprep.mubr.msk.f32.mxu1 %vm2829_vm2, %v3957_v1 }
 0x6dc   : > { %2730 = vrcp.f32 %v1562_v33 }
 0x6dd   : > { %2732 = vrcp.f32 %v1571_v30 }
 0x6de   : > { %2734 = vrcp.f32 %v1986_v38 }
 0x6df   : > { %2736 = vrcp.f32 %v1983_v26 }
 0x6e0   : > { %2738 = vrcp.f32 %v1980_v62 }
 0x6e1   : > { %2740 = vrcp.f32 %v1977_v21 }
 0x6e9   : > { %v2731_v41 = vpop.eup %2730 }
 0x6ea   : > { %v2733_v32 = vpop.eup %2732 }
 0x77e   : > { %v1868_v4 = vpop.f32.mrf.mxu1 }
 0x77f   : > { %v1875_v27 = vmul.f32 %v2731_v41, %v1868_v4  ;;  %v2246_v41 = vld [vmem:[%s3897_s3] sm:$0xf]  ;;  %v2833_v4 = vmov 0  }
 0x780   : > { %v1870_v2 = vpop.f32.mrf.mxu1  ;;  %2583 = vset.pattern.permute.xlu1 %v2833_v4  ;;  %2584 = vset.pattern.permute.xlu0 %v2833_v4 }
 0x781   : > { %v3809_v50 = vadd.f32 %v1875_v27, %v3745_v35  ;;  %v1876_v61 = vmul.f32 %v2733_v32, %v1870_v2  ;;  %v4019_v35 = vsub.f32 %v4017_v58, %v4018_v24  ;;  %2249 = vperm.xlu1 %2583, %v2246_v41  }
 0x783   : > { %v3812_v40 = vadd.f32 %v1876_v61, %v3747_v48  ;;  %v1919_v34 = vmul.f32 1.442695, %v4019_v35  ;;  %v2735_v48 = vpop.eup %2734 }
 0x784   : > { %v2737_v15 = vpop.eup %2736 }
 0x785   : > { %2742 = vpow2.f32 %v1919_v34  ;;  %v2739_v10 = vpop.eup %2738 }
 0x786   : > { %2744 = vpow2.f32 %v1917_v43  ;;  %v2741_v18 = vpop.eup %2740 }
 0x787   : > { %2746 = vpow2.f32 %v1915_v17 }
 0x788   : > { %2748 = vpow2.f32 %v1913_v16 }
 0x789   : > { %2750 = vpow2.f32 %v1911_v56 }
 0x78a   : > { %2752 = vpow2.f32 %v1909_v49 }
 0x78b   : > { %2754 = vpow2.f32 %v1907_v19 }
 0x78c   : > { %2756 = vpow2.f32 %v1905_v57 }
 0x78e   : > { %v2053_v44 = vpop.f32.mrf.mxu1 }
 0x78f   : > { %v2076_v13 = vmul.f32 %v2741_v18, %v2053_v44 }
 0x790   : > { %v2055_v14 = vpop.f32.mrf.mxu1 }
 0x792   : > { %v2058_v42 = vpop.f32.mrf.mxu1  ;;  %v2743_v6 = vpop.eup %2742 }
 0x793   : > { %v2077_v51 = vmul.f32 %v2739_v10, %v2058_v42  ;;  %v2745_v7 = vpop.eup %2744 }
 0x794   : > { %v2060_v54 = vpop.f32.mrf.mxu1  ;;  %v2747_v36 = vpop.eup %2746 }
 0x795   : > { %v2749_v22 = vpop.eup %2748 }
 0x796   : > { %v2063_v52 = vpop.f32.mrf.mxu1  ;;  %v2751_v46 = vpop.eup %2750 }
 0x797   : > { %v2078_v63 = vmul.f32 %v2737_v15, %v2063_v52  ;;  %v2753_v29 = vpop.eup %2752 }
 0x798   : > { %v2065_v28 = vpop.f32.mrf.mxu1  ;;  %v2755_v33 = vpop.eup %2754 }
 0x799   : > { %v2757_v30 = vpop.eup %2756  ;;  %v1930_v61 = vadd.f32 %v2755_v33, %v2751_v46 }
 0x79a   : > { %v2068_v31 = vpop.f32.mrf.mxu1  ;;  %v1921_v2 = vadd.f32 %v2757_v30, %v2753_v29 }
 0x79b   : > { %v2079_v59 = vmul.f32 %v2735_v48, %v2068_v31  ;;  %v1931_v26 = vadd.f32 %v2747_v36, %v1930_v61 }
 0x79c   : > { %v2070_v39 = vpop.f32.mrf.mxu1  ;;  %v1922_v38 = vadd.f32 %v2749_v22, %v1921_v2 }
 0x79d   : > { %2526 = vmatpush3.xpose.msk.msra.mxu1 %vm979_vm3, %v2079_v59  ;;  %v1932_v14 = vadd.f32 %v2743_v6, %v1931_v26 }
 0x79e   : > { %2527 = vmatprep.subr.mxu1 %v3957_v1  ;;  %v1923_v44 = vadd.f32 %v2745_v7, %v1922_v38 }
 0x79f   : > { %v1933_v42 = vrot.slane %v1932_v14, 4 }
 0x7a0   : > { %v1924_v62 = vrot.slane %v1923_v44, 4 }
 0x7a1   : > { %2528 = vmatpush3.xpose.msk.msra.mxu1 %vm979_vm3, %v2078_v63  ;;  %v1934_v21 = vadd.f32 %v1933_v42, %v1932_v14 }
 0x7a2   : > { %2529 = vmatprep.subr.mxu1 %v3957_v1  ;;  %v1925_v54 = vadd.f32 %v1924_v62, %v1923_v44 }
 0x7a3   : > { %v1935_v58 = vrot.slane %v1934_v21, 2 }
 0x7a4   : > { %v1926_v52 = vrot.slane %v1925_v54, 2 }
 0x7a5   : > { %2530 = vmatpush3.xpose.msk.msra.mxu1 %vm979_vm3, %v2077_v51  ;;  %v1936_v35 = vadd.f32 %v1935_v58, %v1934_v21 }
 0x7a6   : > { %2531 = vmatprep.subr.mxu1 %v3957_v1  ;;  %v1927_v24 = vadd.f32 %v1926_v52, %v1925_v54 }
 0x7a7   : > { %v1937_v28 = vrot.slane %v1936_v35, 1 }
 0x7a8   : > { %v1928_v34 = vrot.slane %v1927_v24, 1 }
 0x7a9   : > { %2532 = vmatpush3.xpose.msk.msra.mxu1 %vm979_vm3, %v2076_v13  ;;  %v1938_v31 = vadd.f32 %v1937_v28, %v1936_v35 }
 0x7aa   : > { %2193 = vmatprep.subr.mxu1 %v2743_v6  ;;  %v1929_v48 = vadd.f32 %v1928_v34, %v1927_v24 }
 0x7ac   : > { %2534 = vmatmul.mubr.msk.f32.vlgmr.msra.gmra.mxu1 %vm979_vm3, %v2081_v23  ;;  %2758 = vrcp.f32 %v1929_v48 }
 0x7ad   : > { %2194 = vmatpush1.msra.mxu1 %v2745_v7  ;;  %2233 = vmatprep.mubr.f32.mxu1 %v3957_v1  ;;  %v2297_v1 = vld [vmem:[%s3898_s4] sm:$0xf]  ;;  %2760 = vrcp.f32 %v1938_v31 }
 0x7ae   : > { %2195 = vmatprep.subr.mxu1 %v2747_v36  ;;  %2300 = vperm.xlu1 %2583, %v2297_v1  }
 0x7af   : > { %2196 = vmatpush1.msra.mxu1 %v2749_v22 }
 0x7b0   : > { %2197 = vmatprep.subr.mxu1 %v2751_v46 }
 0x7b1   : > { %2198 = vmatpush1.msra.mxu1 %v2753_v29 }
 0x7b2   : > { %2199 = vmatprep.subr.mxu1 %v2755_v33 }
 0x7b3   : > { %2200 = vmatpush1.msra.mxu1 %v2757_v30 }
 0x7b9   : > { %v2759_v11 = vpop.eup %2758 }
 0x7ba   : > { %v2761_v43 = vpop.eup %2760 }
 0x7fc   : > { %v2250_v17 = vpop.permute.xlu1 %2249 }
 0x829   : > { %v2301_v42 = vpop.permute.xlu1 %2300 }
 0x86c   : > { %v2162_v27 = vpop.f32.mrf.mxu1 }
 0x86d   : > { %2464 = vmatmul.mubr.msk.f32.vlgmr.msra.gmra.mxu1 %vm979_vm3, %v2162_v27 }
 0x86e   : > { %v2535_v32 = vpop.f32.mrf.mxu1 }
 0x92d   : > { %v2235_v0 = vpop.f32.mrf.mxu1 }
 0x92e   : > { %v2242_v9 = vmul.f32 %v2759_v11, %v2235_v0 }
 0x92f   : > { %v2237_v59 = vpop.f32.mrf.mxu1 }
 0x930   : > { %v2244_v25 = vadd.f32 %v2242_v9, %v3809_v50  ;;  %v2243_v47 = vmul.f32 %v2761_v43, %v2237_v59 }
 0x932   : > { %v2245_v39 = vadd.f32 %v2243_v47, %v3812_v40  ;;  %v2252_v8 = vadd.f32 %v2250_v17, %v2244_v25 }
 0x934   : > { %v2253_v55 = vadd.f32 %v2250_v17, %v2245_v39  ;;  %v2254_v16 = vsel %vm419_vm0, %v2252_v8, 0.0 }
 0x935   : > { %v2255_v15 = vrot.slane %v2254_v16, 4 }
 0x936   : > { %v2261_v5 = vsel %vm419_vm0, %v2253_v55, 0.0 }
 0x937   : > { %v2256_v53 = vadd.f32 %v2255_v15, %v2254_v16  ;;  %v2262_v56 = vrot.slane %v2261_v5, 4 }
 0x939   : > { %v2257_v60 = vrot.slane %v2256_v53, 2  ;;  %v2263_v37 = vadd.f32 %v2262_v56, %v2261_v5 }
 0x93b   : > { %v2258_v49 = vadd.f32 %v2257_v60, %v2256_v53  ;;  %v2264_v63 = vrot.slane %v2263_v37, 2 }
 0x93d   : > { %v2259_v20 = vrot.slane %v2258_v49, 1  ;;  %v2265_v3 = vadd.f32 %v2264_v63, %v2263_v37 }
 0x93f   : > { %v2260_v50 = vadd.f32 %v2259_v20, %v2258_v49  ;;  %v2266_v19 = vrot.slane %v2265_v3, 1 }
 0x941   : > { %v2267_v45 = vadd.f32 %v2266_v19, %v2265_v3  ;;  %v2269_v12 = vmul.f32 0.25, %v2260_v50 }
 0x943   : > { %v2270_v40 = vmul.f32 0.25, %v2267_v45  ;;  %v2271_v57 = vsub.f32 %v2252_v8, %v2269_v12 }
 0x945   : > { %v2272_v10 = vsub.f32 %v2253_v55, %v2270_v40  ;;  %v2273_v51 = vmul.f32 %v2271_v57, %v2271_v57 }
 0x947   : > { %v2274_v18 = vmul.f32 %v2272_v10, %v2272_v10  ;;  %v2275_v13 = vsel %vm419_vm0, %v2273_v51, 0.0 }
 0x948   : > { %v2276_v6 = vrot.slane %v2275_v13, 4 }
 0x949   : > { %v2282_v23 = vsel %vm419_vm0, %v2274_v18, 0.0 }
 0x94a   : > { %v2277_v7 = vadd.f32 %v2276_v6, %v2275_v13  ;;  %v2283_v36 = vrot.slane %v2282_v23, 4 }
 0x94c   : > { %v2278_v22 = vrot.slane %v2277_v7, 2  ;;  %v2284_v46 = vadd.f32 %v2283_v36, %v2282_v23 }
 0x94e   : > { %v2279_v29 = vadd.f32 %v2278_v22, %v2277_v7  ;;  %v2285_v33 = vrot.slane %v2284_v46, 2 }
 0x950   : > { %v2280_v30 = vrot.slane %v2279_v29, 1  ;;  %v2286_v41 = vadd.f32 %v2285_v33, %v2284_v46 }
 0x952   : > { %v2281_v4 = vadd.f32 %v2280_v30, %v2279_v29  ;;  %v2287_v1 = vrot.slane %v2286_v41, 1 }
 0x954   : > { %v2288_v27 = vadd.f32 %v2287_v1, %v2286_v41  ;;  %v2289_v32 = vmul.f32 0.25, %v2281_v4 }
 0x956   : > { %v2290_v2 = vmul.f32 0.25, %v2288_v27  ;;  %v2291_v61 = vadd.f32 1e-05, %v2289_v32 }
 0x958   : > { %v2292_v38 = vadd.f32 1e-05, %v2290_v2  ;;  %2762 = vrsqrt.f32 %v2291_v61 }
 0x95a   : > { %2764 = vrsqrt.f32 %v2292_v38 }
 0x965   : > { %v2763_v26 = vpop.eup %2762 }
 0x966   : > { %v2295_v44 = vmul.f32 %v2763_v26, %v2271_v57 }
 0x967   : > { %v2765_v14 = vpop.eup %2764 }
 0x968   : > { %v2296_v62 = vmul.f32 %v2765_v14, %v2272_v10  ;;  %v2303_v54 = vmul.f32 %v2301_v42, %v2295_v44 }
 0x96a   : > { %v2304_v21 = vmul.f32 %v2301_v42, %v2296_v62 }
 0x96c   : > { %v2307_v52 = vcombine.low %v2303_v54, %v2304_v21 }
 0x96e   : > { %2309 = vst [vmem:[%s217_s6] sm:$0xff] %v2307_v52 }
 0x96f   : > { %2779 = shalt.err (!%p2776_p3)
}
 0x970   : > { %s2780_s15 = scalar_lea.hbm %s2323_s10, 128  ;;  %s2784_s23 = scalar_lea.hbm %s3899_s5, 256 }
 0x971   : > { %p2781_p4 = scmp.ne.s32.totalorder %s2323_s10, %s2780_s15  ;;  %p2785_p9 = scmp.lt.s32.totalorder %s2323_s10, %s3899_s5 }
 0x972   : > { %p2786_p10 = scmp.lt.s32.totalorder %s2784_s23, %s2780_s15 }
 0x973   : > { %p2782_p7 = pnand %p2781_p4, %p2903_p5 }
 0x974   : > { %p2787_p11 = por %p2786_p10, %p2785_p9 }
 0x975   : > { %p2783_p8 = pneg %p2782_p7 }
 0x977   : > { %p2788_p12 = pnand %p2787_p11, %p2783_p8 }
 0x979   : > { %2791 = shalt.err (!%p2788_p12)
}
 0x97a   : > { %2538 = dma.vmem_to_hbm [thread:$0]  (%p2903_p5), %s2326_s7, 128, %s2323_s10, %s2311_s11  }
 0x97b PF: > { %p2544_p13 = scmp.ge.s32.totalorder %s2826_s21, 2  ;;  %s2337_s30 = sand.u32 1, %s2814_s18  }
 0x97c   : > { %s2338_s6 = scalar_lea.sflag [#allocation3], %s2337_s30 }
 0x97d   : > { %p2541_p0 = pnand %p2544_p13, %p2907_p6 }
 0x97f   : > { %p2542_p1 = pneg %p2541_p0 }
 0x981   : > { %2809 = dma.done.wait (%p2542_p1), %s2338_s6, 128  }
 0x982   : > { %2811 = vsyncadd (%p2542_p1), %s2338_s6, 4294967168  ;;  %p15_p2 = scmp.ge.s32.totalorder %s2890_s24, 4   ;;  %s4035_s18 = smov %s2818_s19 }
 0x983   : > { %s4036_s19 = smov %s2822_s20  ;;  %s4037_s20 = smov %s2901_s27 }
 0x984   : > { %s4038_s21 = smov %s2890_s24  ;;  %17 = sbr.rel (!%p15_p2) target bundleno = 3 (0x3), region = 75 }
 0x989   :  { %2343 = vsyncpa [#allocation3], 1 }
 0x98a   :  { %2345 = vsyncpa [#allocation3 + $0x1], 1 }

</bundles_post_ra>
